<compile_context>
chip_gen: v5e
topology: v5e:2x2
jax: 0.10.0
libtpu: 0.0.40
codegen_flags: <defaults>
</compile_context>

<pallas_src>
import functools
import math

import numpy as np

import jax
import jax.numpy as jnp
from jax.experimental import pallas as pl
from jax.experimental.pallas import tpu as pltpu


def _vmem_capacity_bytes():
    """Physical VMEM capacity of the local TPU (generation-aware budgeting)."""
    try:
        info = pltpu.get_tpu_info()
        return int(getattr(info, "vmem_capacity_bytes"))
    except Exception:
        return 64 << 20   # conservative default (v7x per-core VMEM)


def _pick_row_tile(H_out, W_out, C_in, C_out, in_itemsize, out_itemsize,
                   lane_budget_bytes):
    """Pick the number of output rows per grid step.

    Returns (th, H_out_padded).  The output tile is (C_out, th*W_out) with the
    flattened spatial positions on lanes, so th*W_out must be a multiple of
    128 unless the tile covers the whole spatial extent (full-dim block).
    """
    # Per-lane VMEM cost of one grid step: double-buffered output tile, the
    # f32 accumulator, and ~2 transient copies of the per-tap input slab.
    per_lane = 2 * C_out * out_itemsize + 4 * C_out + 3 * C_in * in_itemsize
    max_lane = min(max(lane_budget_bytes // per_lane, W_out), 8192)

    # 1) Whole output plane of one batch element in a single tile
    #    (full-dim block: no 128-divisibility requirement, no padding).
    if H_out * W_out <= max_lane:
        return H_out, H_out

    # 2) Largest divisor of H_out whose lane width is a multiple of 128.
    for th in range(H_out - 1, 0, -1):
        if H_out % th == 0 and (th * W_out) % 128 == 0 and th * W_out <= max_lane:
            return th, H_out

    # 3) Fallback: pad H_out.  Smallest th with th*W_out % 128 == 0, grown to
    #    fill the budget.  The few padded rows are sliced off after the call.
    th0 = 128 // math.gcd(W_out, 128)
    th = max(max_lane // (th0 * W_out), 1) * th0
    th = min(th, -(-H_out // th0) * th0)
    H_out_p = -(-H_out // th) * th
    return th, H_out_p


def _make_fused_conv_kernel(*, K, stride, th, W_out, C_in, C_out, n_row_tiles):
    lane = th * W_out

    def kernel(x_ref, w_ref, b_ref, o_ref):
        # x_ref : (1, C_in, H_pad, W_pad)   padded activations, one batch elem
        # w_ref : (K*K, C_out, C_in)        per-tap weight matrices
        # b_ref : (C_out, 1)                bias column (f32)
        # o_ref : (1, C_out, th*W_out)      lane-dense transposed output tile
        if n_row_tiles == 1:
            row_base = 0                                    # fully static slicing
        else:
            row_base = pl.multiple_of(pl.program_id(1) * (th * stride),
                                      th * stride)
        acc = jnp.zeros((C_out, lane), jnp.float32)
        for kh in range(K):
            for kw in range(K):
                if stride == 1:
                    slab = x_ref[0, :, pl.ds(row_base + kh, th),
                                 pl.ds(kw, W_out)]
                else:
                    # TODO(synk): general-stride path (strided ref windows) is
                    # correct but untuned.
                    slab = x_ref[0, :, pl.ds(row_base + kh, th, stride),
                                 pl.ds(kw, W_out, stride)]
                patch = slab.reshape(C_in, lane)            # (C_in, th*W_out)
                acc = acc + jnp.dot(w_ref[kh * K + kw], patch,
                                    preferred_element_type=jnp.float32)
        o_ref[0] = (acc + b_ref[...]).astype(o_ref.dtype)

    return kernel


@functools.partial(jax.jit,
                   static_argnames=("kernel_size", "stride", "padding",
                                    "compute_dtype"))
def my_conv2d(x, w, b, *, kernel_size, stride, padding, compute_dtype=None):
    """x: (B, C_in, H, W) NCHW; w: (C_out, C_in, K, K); b: (C_out,)."""
    B, C_in, H_in, W_in = x.shape
    C_out = w.shape[0]
    K = kernel_size
    out_dtype = x.dtype
    cd = np.dtype(compute_dtype) if compute_dtype is not None else np.dtype(x.dtype)

    H_out = (H_in + 2 * padding - K) // stride + 1
    W_out = (W_in + 2 * padding - K) // stride + 1
    W_pad = W_in + 2 * padding

    in_itemsize = cd.itemsize
    out_itemsize = np.dtype(out_dtype).itemsize

    # Generation-aware VMEM budgeting (v7x: 64 MiB, v5e/v6e: 128 MiB).
    vmem_cap = _vmem_capacity_bytes()
    plane_bytes = C_in * (H_in + 2 * padding) * W_pad * in_itemsize
    wk_bytes = K * K * C_out * C_in * in_itemsize
    resident = 2 * plane_bytes + 2 * wk_bytes + 2 * 4 * C_out   # double-buffered
    lane_budget = max(int(0.55 * vmem_cap) - resident, 1 << 20)

    th, H_out_p = _pick_row_tile(H_out, W_out, C_in, C_out,
                                 in_itemsize, out_itemsize, lane_budget)
    n_row_tiles = H_out_p // th
    extra_rows = (H_out_p - H_out) * stride
    H_pad_total = H_in + 2 * padding + extra_rows

    # Host-side zero padding is a single cheap pass; im2col itself is fused.
    xp = jnp.pad(x, ((0, 0), (0, 0),
                     (padding, padding + extra_rows),
                     (padding, padding))).astype(cd)
    # Per-tap weight matrices in (kh, kw) order: wk[kh*K + kw] == W[:, :, kh, kw].
    wk = w.transpose(2, 3, 0, 1).reshape(K * K, C_out, C_in).astype(cd)
    b_col = b.astype(jnp.float32).reshape(C_out, 1)

    lane = th * W_out
    tile_bytes = lane * (2 * C_out * out_itemsize + 4 * C_out
                         + 3 * C_in * in_itemsize)
    vmem_limit = int(min(max(resident + tile_bytes + (4 << 20), 32 << 20),
                         int(0.8 * vmem_cap)))

    flops = 2 * B * (K * K * C_in) * C_out * (H_out_p * W_out)
    bytes_accessed = (xp.size * in_itemsize + wk.size * in_itemsize
                      + C_out * 4 + B * C_out * H_out_p * W_out * out_itemsize)

    kernel = _make_fused_conv_kernel(K=K, stride=stride, th=th, W_out=W_out,
                                     C_in=C_in, C_out=C_out,
                                     n_row_tiles=n_row_tiles)

    out = pl.pallas_call(
        kernel,
        out_shape=jax.ShapeDtypeStruct((B, C_out, H_out_p * W_out), out_dtype),
        grid_spec=pltpu.PrefetchScalarGridSpec(
            num_scalar_prefetch=0,
            grid=(B, n_row_tiles),                 # b slow, row-band fast
            in_specs=[
                # Padded activation plane: DMA'd once per batch element (index
                # map ignores j) and reused for every output row band.
                pl.BlockSpec((1, C_in, H_pad_total, W_pad),
                             lambda bb, jj: (bb, 0, 0, 0)),
                pl.BlockSpec((K * K, C_out, C_in), lambda bb, jj: (0, 0, 0)),
                pl.BlockSpec((C_out, 1), lambda bb, jj: (0, 0)),
            ],
            out_specs=pl.BlockSpec((1, C_out, lane), lambda bb, jj: (bb, 0, jj)),
        ),
        compiler_params=pltpu.CompilerParams(
            dimension_semantics=("parallel", "parallel"),
            vmem_limit_bytes=vmem_limit),
        cost_estimate=pl.CostEstimate(flops=flops, transcendentals=0,
                                      bytes_accessed=bytes_accessed),
    )(xp, wk, b_col)                               # (B, C_out, H_out_p*W_out)

    if H_out_p != H_out:
        # Rare fallback only: strip padded output rows (they hold bias values).
        out = out[:, :, : H_out * W_out]
    # Lane-dense layout is already channel-major: free contiguous reshape.
    return out.reshape(B, C_out, H_out, W_out)


if __name__ == "__main__":
    # Module config (small, consistent with the forward semantics)
    in_channels, out_channels = 4, 8
    kernel_size, stride, padding = 3, 1, 1

    key = jax.random.PRNGKey(0)
    kx, kw_key = jax.random.split(key)

    # Deterministic parameter init: W ~ 0.01 * randn, b = zeros (as in __init__)
    W = 0.01 * jax.random.normal(
        kw_key, (out_channels, in_channels, kernel_size, kernel_size),
        dtype=jnp.float32)
    b = jnp.zeros((out_channels,), dtype=jnp.float32)

    # Example input: (B, C_in, H, W) NCHW
    x = jax.random.normal(kx, (2, in_channels, 16, 16), dtype=jnp.float32)

    # Pure-JAX reference
    ref = jax.lax.conv_general_dilated(
        x, W, window_strides=(stride, stride),
        padding=[(padding, padding), (padding, padding)],
        dimension_numbers=("NCHW", "OIHW", "NCHW"),
    ) + b.reshape(1, -1, 1, 1)

    # f32 path (exact module semantics)
    out = my_conv2d(x, W, b, kernel_size=kernel_size, stride=stride,
                    padding=padding)
    out = jax.block_until_ready(out)
    assert out.shape == (2, out_channels, 16, 16)
    assert jnp.allclose(out, ref, atol=1e-5, rtol=1e-5)

    # bf16-streamed path (halves the dominant HBM stream; f32 accumulation)
    out_bf16 = my_conv2d(x, W, b, kernel_size=kernel_size, stride=stride,
                         padding=padding, compute_dtype=jnp.bfloat16)
    out_bf16 = jax.block_until_ready(out_bf16)
    assert out_bf16.shape == (2, out_channels, 16, 16)
    assert jnp.allclose(out_bf16, ref, atol=5e-3, rtol=5e-2)

    print("KERNEL_OK")
</pallas_src>

<mosaic_0001>
module attributes {stable_mosaic.version = 11 : i64} {
  func.func @kernel(%arg0: i32, %arg1: i32, %arg2: memref<1x4x18x18xf32, #tpu.memory_space<vmem>>, %arg3: memref<9x8x4xf32, #tpu.memory_space<vmem>>, %arg4: memref<8x1xf32, #tpu.memory_space<vmem>>, %arg5: memref<1x8x256xf32, #tpu.memory_space<vmem>>) attributes {dimension_semantics = [#tpu.dimension_semantics<parallel>, #tpu.dimension_semantics<parallel>], iteration_bounds = array<i64: 2, 1>, scalar_prefetch = 0 : i64, scratch_operands = 0 : i64, tpu.core_type = #tpu.core_type<tc>, window_params = [{transform_indices = @transform_0, window_bounds = array<i64: 1, 4, 18, 18>}, {pipeline_mode = #tpu.pipeline_mode<synchronous>, transform_indices = @transform_1, window_bounds = array<i64: 9, 8, 4>}, {pipeline_mode = #tpu.pipeline_mode<synchronous>, transform_indices = @transform_2, window_bounds = array<i64: 8, 1>}, {transform_indices = @transform_3, window_bounds = array<i64: 1, 8, 256>}]} {
    %cst = arith.constant 0.000000e+00 : f32
    %0 = vector.broadcast %cst : f32 to vector<8x256xf32>
    %c0 = arith.constant 0 : index
    %c0_0 = arith.constant 0 : index
    %c0_1 = arith.constant 0 : index
    %c0_2 = arith.constant 0 : index
    %1 = vector.load %arg2[%c0, %c0_0, %c0_1, %c0_2] : memref<1x4x18x18xf32, #tpu.memory_space<vmem>>, vector<1x4x16x16xf32>
    %2 = vector.shape_cast %1 : vector<1x4x16x16xf32> to vector<4x16x16xf32>
    %3 = vector.shape_cast %2 : vector<4x16x16xf32> to vector<4x256xf32>
    %c0_3 = arith.constant 0 : index
    %c0_4 = arith.constant 0 : index
    %c0_5 = arith.constant 0 : index
    %4 = vector.load %arg3[%c0_3, %c0_4, %c0_5] : memref<9x8x4xf32, #tpu.memory_space<vmem>>, vector<1x8x4xf32>
    %5 = vector.shape_cast %4 : vector<1x8x4xf32> to vector<8x4xf32>
    %cst_6 = arith.constant dense<0.000000e+00> : vector<8x256xf32>
    %6 = tpu.matmul %5, %3, %cst_6 {dimension_numbers = #tpu.dot_dimension_numbers<[1], [0], [0], [1], [0, 0, 1, 1], [], []>} : vector<8x4xf32>, vector<4x256xf32>, vector<8x256xf32> -> vector<8x256xf32>
    %7 = arith.addf %0, %6 : vector<8x256xf32>
    %c0_7 = arith.constant 0 : index
    %c0_8 = arith.constant 0 : index
    %c0_9 = arith.constant 0 : index
    %c1 = arith.constant 1 : index
    %8 = vector.load %arg2[%c0_7, %c0_8, %c0_9, %c1] : memref<1x4x18x18xf32, #tpu.memory_space<vmem>>, vector<1x4x16x16xf32>
    %9 = vector.shape_cast %8 : vector<1x4x16x16xf32> to vector<4x16x16xf32>
    %10 = vector.shape_cast %9 : vector<4x16x16xf32> to vector<4x256xf32>
    %c1_10 = arith.constant 1 : index
    %c0_11 = arith.constant 0 : index
    %c0_12 = arith.constant 0 : index
    %11 = vector.load %arg3[%c1_10, %c0_11, %c0_12] : memref<9x8x4xf32, #tpu.memory_space<vmem>>, vector<1x8x4xf32>
    %12 = vector.shape_cast %11 : vector<1x8x4xf32> to vector<8x4xf32>
    %cst_13 = arith.constant dense<0.000000e+00> : vector<8x256xf32>
    %13 = tpu.matmul %12, %10, %cst_13 {dimension_numbers = #tpu.dot_dimension_numbers<[1], [0], [0], [1], [0, 0, 1, 1], [], []>} : vector<8x4xf32>, vector<4x256xf32>, vector<8x256xf32> -> vector<8x256xf32>
    %14 = arith.addf %7, %13 : vector<8x256xf32>
    %c0_14 = arith.constant 0 : index
    %c0_15 = arith.constant 0 : index
    %c0_16 = arith.constant 0 : index
    %c2 = arith.constant 2 : index
    %15 = vector.load %arg2[%c0_14, %c0_15, %c0_16, %c2] : memref<1x4x18x18xf32, #tpu.memory_space<vmem>>, vector<1x4x16x16xf32>
    %16 = vector.shape_cast %15 : vector<1x4x16x16xf32> to vector<4x16x16xf32>
    %17 = vector.shape_cast %16 : vector<4x16x16xf32> to vector<4x256xf32>
    %c2_17 = arith.constant 2 : index
    %c0_18 = arith.constant 0 : index
    %c0_19 = arith.constant 0 : index
    %18 = vector.load %arg3[%c2_17, %c0_18, %c0_19] : memref<9x8x4xf32, #tpu.memory_space<vmem>>, vector<1x8x4xf32>
    %19 = vector.shape_cast %18 : vector<1x8x4xf32> to vector<8x4xf32>
    %cst_20 = arith.constant dense<0.000000e+00> : vector<8x256xf32>
    %20 = tpu.matmul %19, %17, %cst_20 {dimension_numbers = #tpu.dot_dimension_numbers<[1], [0], [0], [1], [0, 0, 1, 1], [], []>} : vector<8x4xf32>, vector<4x256xf32>, vector<8x256xf32> -> vector<8x256xf32>
    %21 = arith.addf %14, %20 : vector<8x256xf32>
    %c0_21 = arith.constant 0 : index
    %c0_22 = arith.constant 0 : index
    %c1_23 = arith.constant 1 : index
    %c0_24 = arith.constant 0 : index
    %22 = vector.load %arg2[%c0_21, %c0_22, %c1_23, %c0_24] : memref<1x4x18x18xf32, #tpu.memory_space<vmem>>, vector<1x4x16x16xf32>
    %23 = vector.shape_cast %22 : vector<1x4x16x16xf32> to vector<4x16x16xf32>
    %24 = vector.shape_cast %23 : vector<4x16x16xf32> to vector<4x256xf32>
    %c3 = arith.constant 3 : index
    %c0_25 = arith.constant 0 : index
    %c0_26 = arith.constant 0 : index
    %25 = vector.load %arg3[%c3, %c0_25, %c0_26] : memref<9x8x4xf32, #tpu.memory_space<vmem>>, vector<1x8x4xf32>
    %26 = vector.shape_cast %25 : vector<1x8x4xf32> to vector<8x4xf32>
    %cst_27 = arith.constant dense<0.000000e+00> : vector<8x256xf32>
    %27 = tpu.matmul %26, %24, %cst_27 {dimension_numbers = #tpu.dot_dimension_numbers<[1], [0], [0], [1], [0, 0, 1, 1], [], []>} : vector<8x4xf32>, vector<4x256xf32>, vector<8x256xf32> -> vector<8x256xf32>
    %28 = arith.addf %21, %27 : vector<8x256xf32>
    %c0_28 = arith.constant 0 : index
    %c0_29 = arith.constant 0 : index
    %c1_30 = arith.constant 1 : index
    %c1_31 = arith.constant 1 : index
    %29 = vector.load %arg2[%c0_28, %c0_29, %c1_30, %c1_31] : memref<1x4x18x18xf32, #tpu.memory_space<vmem>>, vector<1x4x16x16xf32>
    %30 = vector.shape_cast %29 : vector<1x4x16x16xf32> to vector<4x16x16xf32>
    %31 = vector.shape_cast %30 : vector<4x16x16xf32> to vector<4x256xf32>
    %c4 = arith.constant 4 : index
    %c0_32 = arith.constant 0 : index
    %c0_33 = arith.constant 0 : index
    %32 = vector.load %arg3[%c4, %c0_32, %c0_33] : memref<9x8x4xf32, #tpu.memory_space<vmem>>, vector<1x8x4xf32>
    %33 = vector.shape_cast %32 : vector<1x8x4xf32> to vector<8x4xf32>
    %cst_34 = arith.constant dense<0.000000e+00> : vector<8x256xf32>
    %34 = tpu.matmul %33, %31, %cst_34 {dimension_numbers = #tpu.dot_dimension_numbers<[1], [0], [0], [1], [0, 0, 1, 1], [], []>} : vector<8x4xf32>, vector<4x256xf32>, vector<8x256xf32> -> vector<8x256xf32>
    %35 = arith.addf %28, %34 : vector<8x256xf32>
    %c0_35 = arith.constant 0 : index
    %c0_36 = arith.constant 0 : index
    %c1_37 = arith.constant 1 : index
    %c2_38 = arith.constant 2 : index
    %36 = vector.load %arg2[%c0_35, %c0_36, %c1_37, %c2_38] : memref<1x4x18x18xf32, #tpu.memory_space<vmem>>, vector<1x4x16x16xf32>
    %37 = vector.shape_cast %36 : vector<1x4x16x16xf32> to vector<4x16x16xf32>
    %38 = vector.shape_cast %37 : vector<4x16x16xf32> to vector<4x256xf32>
    %c5 = arith.constant 5 : index
    %c0_39 = arith.constant 0 : index
    %c0_40 = arith.constant 0 : index
    %39 = vector.load %arg3[%c5, %c0_39, %c0_40] : memref<9x8x4xf32, #tpu.memory_space<vmem>>, vector<1x8x4xf32>
    %40 = vector.shape_cast %39 : vector<1x8x4xf32> to vector<8x4xf32>
    %cst_41 = arith.constant dense<0.000000e+00> : vector<8x256xf32>
    %41 = tpu.matmul %40, %38, %cst_41 {dimension_numbers = #tpu.dot_dimension_numbers<[1], [0], [0], [1], [0, 0, 1, 1], [], []>} : vector<8x4xf32>, vector<4x256xf32>, vector<8x256xf32> -> vector<8x256xf32>
    %42 = arith.addf %35, %41 : vector<8x256xf32>
    %c0_42 = arith.constant 0 : index
    %c0_43 = arith.constant 0 : index
    %c2_44 = arith.constant 2 : index
    %c0_45 = arith.constant 0 : index
    %43 = vector.load %arg2[%c0_42, %c0_43, %c2_44, %c0_45] : memref<1x4x18x18xf32, #tpu.memory_space<vmem>>, vector<1x4x16x16xf32>
    %44 = vector.shape_cast %43 : vector<1x4x16x16xf32> to vector<4x16x16xf32>
    %45 = vector.shape_cast %44 : vector<4x16x16xf32> to vector<4x256xf32>
    %c6 = arith.constant 6 : index
    %c0_46 = arith.constant 0 : index
    %c0_47 = arith.constant 0 : index
    %46 = vector.load %arg3[%c6, %c0_46, %c0_47] : memref<9x8x4xf32, #tpu.memory_space<vmem>>, vector<1x8x4xf32>
    %47 = vector.shape_cast %46 : vector<1x8x4xf32> to vector<8x4xf32>
    %cst_48 = arith.constant dense<0.000000e+00> : vector<8x256xf32>
    %48 = tpu.matmul %47, %45, %cst_48 {dimension_numbers = #tpu.dot_dimension_numbers<[1], [0], [0], [1], [0, 0, 1, 1], [], []>} : vector<8x4xf32>, vector<4x256xf32>, vector<8x256xf32> -> vector<8x256xf32>
    %49 = arith.addf %42, %48 : vector<8x256xf32>
    %c0_49 = arith.constant 0 : index
    %c0_50 = arith.constant 0 : index
    %c2_51 = arith.constant 2 : index
    %c1_52 = arith.constant 1 : index
    %50 = vector.load %arg2[%c0_49, %c0_50, %c2_51, %c1_52] : memref<1x4x18x18xf32, #tpu.memory_space<vmem>>, vector<1x4x16x16xf32>
    %51 = vector.shape_cast %50 : vector<1x4x16x16xf32> to vector<4x16x16xf32>
    %52 = vector.shape_cast %51 : vector<4x16x16xf32> to vector<4x256xf32>
    %c7 = arith.constant 7 : index
    %c0_53 = arith.constant 0 : index
    %c0_54 = arith.constant 0 : index
    %53 = vector.load %arg3[%c7, %c0_53, %c0_54] : memref<9x8x4xf32, #tpu.memory_space<vmem>>, vector<1x8x4xf32>
    %54 = vector.shape_cast %53 : vector<1x8x4xf32> to vector<8x4xf32>
    %cst_55 = arith.constant dense<0.000000e+00> : vector<8x256xf32>
    %55 = tpu.matmul %54, %52, %cst_55 {dimension_numbers = #tpu.dot_dimension_numbers<[1], [0], [0], [1], [0, 0, 1, 1], [], []>} : vector<8x4xf32>, vector<4x256xf32>, vector<8x256xf32> -> vector<8x256xf32>
    %56 = arith.addf %49, %55 : vector<8x256xf32>
    %c0_56 = arith.constant 0 : index
    %c0_57 = arith.constant 0 : index
    %c2_58 = arith.constant 2 : index
    %c2_59 = arith.constant 2 : index
    %57 = vector.load %arg2[%c0_56, %c0_57, %c2_58, %c2_59] : memref<1x4x18x18xf32, #tpu.memory_space<vmem>>, vector<1x4x16x16xf32>
    %58 = vector.shape_cast %57 : vector<1x4x16x16xf32> to vector<4x16x16xf32>
    %59 = vector.shape_cast %58 : vector<4x16x16xf32> to vector<4x256xf32>
    %c8 = arith.constant 8 : index
    %c0_60 = arith.constant 0 : index
    %c0_61 = arith.constant 0 : index
    %60 = vector.load %arg3[%c8, %c0_60, %c0_61] : memref<9x8x4xf32, #tpu.memory_space<vmem>>, vector<1x8x4xf32>
    %61 = vector.shape_cast %60 : vector<1x8x4xf32> to vector<8x4xf32>
    %cst_62 = arith.constant dense<0.000000e+00> : vector<8x256xf32>
    %62 = tpu.matmul %61, %59, %cst_62 {dimension_numbers = #tpu.dot_dimension_numbers<[1], [0], [0], [1], [0, 0, 1, 1], [], []>} : vector<8x4xf32>, vector<4x256xf32>, vector<8x256xf32> -> vector<8x256xf32>
    %63 = arith.addf %56, %62 : vector<8x256xf32>
    %c0_63 = arith.constant 0 : index
    %c0_64 = arith.constant 0 : index
    %64 = vector.load %arg4[%c0_63, %c0_64] : memref<8x1xf32, #tpu.memory_space<vmem>>, vector<8x1xf32>
    %65 = vector.broadcast %64 : vector<8x1xf32> to vector<8x256xf32>
    %66 = arith.addf %63, %65 : vector<8x256xf32>
    %c0_65 = arith.constant 0 : index
    %c0_66 = arith.constant 0 : index
    %c0_67 = arith.constant 0 : index
    %67 = vector.load %arg5[%c0_65, %c0_66, %c0_67] : memref<1x8x256xf32, #tpu.memory_space<vmem>>, vector<1x8x256xf32>
    %68 = vector.shape_cast %67 : vector<1x8x256xf32> to vector<8x256xf32>
    %69 = vector.shape_cast %66 : vector<8x256xf32> to vector<1x8x256xf32>
    tpu.vector_store %arg5[%c0_65, %c0_66, %c0_67], %69 {strides = array<i32>} : memref<1x8x256xf32, #tpu.memory_space<vmem>>, vector<1x8x256xf32>,
    return
  }
  func.func @transform_0(%arg0: i32, %arg1: i32) -> (i32, i32, i32, i32) {
    %c0_i32 = arith.constant 0 : i32
    %c0_i32_0 = arith.constant 0 : i32
    %c0_i32_1 = arith.constant 0 : i32
    %c0_i32_2 = arith.constant 0 : i32
    return %arg0, %c0_i32, %c0_i32_0, %c0_i32_1 : i32, i32, i32, i32
  }
  func.func @transform_1(%arg0: i32, %arg1: i32) -> (i32, i32, i32) {
    %c0_i32 = arith.constant 0 : i32
    %c0_i32_0 = arith.constant 0 : i32
    %c0_i32_1 = arith.constant 0 : i32
    %c0_i32_2 = arith.constant 0 : i32
    return %c0_i32, %c0_i32_0, %c0_i32_1 : i32, i32, i32
  }
  func.func @transform_2(%arg0: i32, %arg1: i32) -> (i32, i32) {
    %c0_i32 = arith.constant 0 : i32
    %c0_i32_0 = arith.constant 0 : i32
    %c0_i32_1 = arith.constant 0 : i32
    return %c0_i32, %c0_i32_0 : i32, i32
  }
  func.func @transform_3(%arg0: i32, %arg1: i32) -> (i32, i32, i32) {
    %c0_i32 = arith.constant 0 : i32
    %c0_i32_0 = arith.constant 0 : i32
    return %arg0, %c0_i32, %arg1 : i32, i32, i32
  }
}

</mosaic_0001>

<bundles_post_ra>
// kernel: my_conv2d.1
= control target key start
LH: loop header
LB: loop body
LE: loop exit
PB: predicated region body
PF: predicated region fallthrough
CT: control target
= control target key end

     0   :  { %s2810_s12 = smov 0   ;;  %s2812_s13 = smov 0   ;;  %s3967_s0 = inlined_call_operand.vmem [shape: f32[2,4,18,18], index: 0, kind: input, shape index: {}]   ;;  %s3968_s1 = inlined_call_operand.vmem [shape: f32[9,8,4], index: 1, kind: input, shape index: {}]   ;;  %s3969_s2 = inlined_call_operand.vmem [shape: f32[8,1], index: 2, kind: input, shape index: {}]   ;;  %s3970_s3 = inlined_call_operand.vmem [shape: f32[2,8,256], index: 3, kind: output, shape index: {}]  }
   0x1   :  { %s2814_s14 = smov 0  }
   0x2 LB: > { %s25_s15 = sadd.s32 1, %s2772_s13  ;;  %p2665_p0 = scmp.ge.s32.totalorder %s2776_s14, 1  ;;  %s2776_s14 = sphi %s2814_s14, %s13_s14   ;;  %s2772_s13 = sphi %s2812_s13, %s3972_s13   ;;  %s2768_s12 = sphi %s2810_s12, %s3971_s12  }
   0x3   : > { %p27_p1 = scmp.ge.s32.totalorder %s25_s15, 2  ;;  %p151_p2 = scmp.lt.s32.totalorder %s2776_s14, 3 }
   0x5   : > { %s3974_s15 = smov (%p27_p1, %s25_s15), 0  ;;  %p152_p3 = pnand %p2665_p0, %p151_p2 }
   0x6   : > { %p179_p4 = scmp.lt.s32.totalorder (!%p152_p3), %s2768_s12, 1  ;;  %s2780_s20 = smov (!%p152_p3), 64  }
   0x7   : > { %155 = sbr.rel (%p152_p3) target bundleno = 1023 (0x3ff), region = 32  ;;  %s2781_s21 = smov (!%p152_p3), 32  }
   0x8   : > { %s2782_s22 = smov (!%p152_p3), 96   ;;  %s2783_s23 = smov (!%p152_p3), 48  }
   0x9   : > { %s2784_s24 = smov (!%p152_p3), 16   ;;  %s2785_s25 = smov (!%p152_p3), 112  }
   0xa   : > { %s2786_s26 = smov (!%p152_p3), 80   ;;  %s2787_s27 = smov (!%p152_p3), 127  }
   0xb   : > { %s2788_s28 = smov (!%p152_p3), 126  }
   0xc   : > { %s3976_s12 = smov (!%p179_p4, %s2768_s12), 1  ;;  %v2778_v0 = vmov 1983009808   ;;  %vm203_vm0 = vcmask 1047556   ;;  %v2779_v10 = vmov 1934713408  }
   0xd   : > { %v208_v1 = vunpack.c.l.s4 %v2778_v0  ;;  %s2716_s16 = smul.u32 96, %s3976_s12  ;;  %v232_v11 = vunpack.c.l.s4 %v2779_v10  ;;  %vm371_vm1 = vcmask 130048   ;;  %vm373_vm2 = vcmask 261120  }
   0xe   : > { %vm375_vm3 = vcmask 392192   ;;  %vm377_vm4 = vcmask 523264   ;;  %vm379_vm5 = vcmask 654336   ;;  %vm381_vm6 = vcmask 785408  }
   0xf   : > { %s2834_s19 = scalar_lea.vmem %s3967_s0, %s2716_s16  ;;  %v2845_v5 = vunpack.c.0.s8 %v208_v1  ;;  %v2878_v25 = vunpack.c.0.s8 %v232_v11  ;;  %vm383_vm7 = vcmask 916480   ;;  %vm613_vm8 = vcmask 1043456  }
  0x10   : > { %v2837_v2 = vld [vmem:[%s2834_s19] sm:$0xff]  ;;  %v2840_v3 = vld [vmem:[%s2834_s19 + $0x18] sm:$0xff]  ;;  %v2843_v4 = vld [vmem:[%s2834_s19 + $0x30] sm:$0xff]  ;;  %vm609_vm9 = vcmask 31744  }
  0x11   : > { %v2848_v6 = vld [vmem:[%s2834_s19 + $0x48] sm:$0xff]  ;;  %v202_v7 = vrot.slane %v2843_v4, 4  ;;  %v205_v8 = vrot.slane %v2837_v2, 4  ;;  %v217_v9 = vrot.slane %v2840_v3, 4  ;;  %v2855_v13 = vld [vmem:[%s2834_s19 + $0x38] sm:$0xff]  ;;  %v2858_v14 = vld [vmem:[%s2834_s19 + $0x50] sm:$0xff] }
  0x12   : > { %v215_v12 = vrot.slane %v2848_v6, 4  ;;  %v2867_v18 = vld [vmem:[%s2834_s19 + $0x8] sm:$0xff]  ;;  %v259_v19 = vrot.slane %v2855_v13, 4  ;;  %v2876_v24 = vld [vmem:[%s2834_s19 + $0x20] sm:$0xff]  ;;  %v271_v27 = vrot.slane %v2858_v14, 4 }
  0x13   : > { %v206_v15 = vsel %vm203_vm0, %v2843_v4, %v205_v8  ;;  %v218_v16 = vsel %vm203_vm0, %v2848_v6, %v217_v9  ;;  %v204_v17 = vsel %vm203_vm0, %v202_v7, %v2837_v2  ;;  %v273_v34 = vrot.slane %v2876_v24, 4 }
  0x14   : > { %v214_v20 = vperm.slane %v206_v15, %v2845_v5  ;;  %v226_v21 = vperm.slane %v218_v16, %v2845_v5  ;;  %v210_v22 = vperm.slane %v204_v17, %v2845_v5  ;;  %v216_v23 = vsel %vm203_vm0, %v215_v12, %v2840_v3 }
  0x15   : > { %v222_v26 = vperm.slane %v216_v23, %v2845_v5  ;;  %v260_v31 = vsel %vm203_vm0, %v259_v19, %v2867_v18  ;;  %v272_v33 = vsel %vm203_vm0, %v271_v27, %v2876_v24  ;;  %v261_v50 = vrot.slane %v2867_v18, 4 }
  0x16   : > { %v239_v28 = vrot.slane %v226_v21, 4  ;;  %v241_v29 = vrot.slane %v214_v20, 4  ;;  %v229_v30 = vrot.slane %v210_v22, 4  ;;  %v278_v37 = vperm.slane %v272_v33, %v2845_v5 }
  0x17   : > { %v227_v32 = vrot.slane %v222_v26, 4  ;;  %v266_v42 = vperm.slane %v260_v31, %v2845_v5  ;;  %v274_v51 = vsel %vm203_vm0, %v2858_v14, %v273_v34  ;;  %v262_v57 = vsel %vm203_vm0, %v2855_v13, %v261_v50 }
  0x18   : > { %v240_v35 = vsel %vm203_vm0, %v239_v28, %v214_v20  ;;  %v230_v36 = vsel %vm203_vm0, %v222_v26, %v229_v30  ;;  %v242_v38 = vsel %vm203_vm0, %v226_v21, %v241_v29  ;;  %v283_v44 = vrot.slane %v278_v37, 4 }
  0x19   : > { %v246_v39 = vperm.slane %v240_v35, %v2878_v25  ;;  %v238_v40 = vperm.slane %v230_v36, %v2878_v25  ;;  %v228_v41 = vsel %vm203_vm0, %v227_v32, %v210_v22  ;;  %v250_v45 = vperm.slane %v242_v38, %v2878_v25 }
  0x1a   : > { %v2896_v43 = vperm.slane %v228_v41, %v2878_v25  ;;  %v285_v46 = vrot.slane %v266_v42, 4  ;;  %v284_v49 = vsel %vm203_vm0, %v283_v44, %v266_v42  ;;  %v282_v56 = vperm.slane %v274_v51, %v2845_v5 }
  0x1b   : > { %328 = vrot.lane.b32.xlu1 %v246_v39, %s2780_s20  ;;  %320 = vrot.lane.b32.xlu0 %v238_v40, %s2781_s21  ;;  %v253_v47 = vrot.slane %v238_v40, 4  ;;  %v2911_v55 = vperm.slane %v284_v49, %v2878_v25  ;;  %v257_v60 = vrot.slane %v250_v45, 4  ;;  %v270_v61 = vperm.slane %v262_v57, %v2845_v5 }
  0x1c   : > { %v251_v48 = vrot.slane %v2896_v43, 4  ;;  %336 = vrot.lane.b32.xlu2 %v250_v45, %s2782_s22  ;;  %v286_v52 = vsel %vm203_vm0, %v278_v37, %v285_v46  ;;  %v295_v62 = vrot.slane %v282_v56, 4  ;;  %v255_v63 = vrot.slane %v246_v39, 4 }
  0x1d   : > { %v254_v53 = vsel %vm203_vm0, 0.0, %v253_v47  ;;  %v294_v58 = vperm.slane %v286_v52, %v2878_v25  ;;  %v307_v59 = vrot.slane %v2911_v55, 4  ;;  %v258_v1 = vsel %vm203_vm0, 0.0, %v257_v60 }
  0x1e   : > { %v252_v54 = vsel %vm203_vm0, 0.0, %v251_v48  ;;  %v296_v7 = vsel %vm203_vm0, %v295_v62, %v270_v61  ;;  %v297_v8 = vrot.slane %v270_v61, 4  ;;  %v256_v9 = vsel %vm203_vm0, 0.0, %v255_v63 }
  0x1f   : > { %v308_v0 = vsel %vm203_vm0, 0.0, %v307_v59  ;;  %v302_v10 = vperm.slane %v296_v7, %v2878_v25  ;;  %v309_v11 = vrot.slane %v294_v58, 4 }
  0x20   : > { %v298_v12 = vsel %vm203_vm0, %v282_v56, %v297_v8 }
  0x21   : > { %v311_v15 = vrot.slane %v302_v10, 4  ;;  %v310_v16 = vsel %vm203_vm0, 0.0, %v309_v11  ;;  %v306_v17 = vperm.slane %v298_v12, %v2878_v25 }
  0x23   : > { %324 = vrot.lane.b32.xlu1 %v254_v53, %s2783_s23  ;;  %316 = vrot.lane.b32.xlu0 %v252_v54, %s2784_s24  ;;  %v312_v19 = vsel %vm203_vm0, 0.0, %v311_v15  ;;  %v313_v20 = vrot.slane %v306_v17, 4 }
  0x24   : > { %348 = vrot.lane.b32.xlu2 %v294_v58, %s2781_s21 }
  0x25   : > { %v314_v21 = vsel %vm203_vm0, 0.0, %v313_v20 }
  0x2b   : > { %344 = vrot.lane.b32.xlu1 %v308_v0, %s2784_s24  ;;  %340 = vrot.lane.b32.xlu0 %v258_v1, %s2785_s25 }
  0x2c   : > { %332 = vrot.lane.b32.xlu2 %v256_v9, %s2786_s26 }
  0x33   : > { %356 = vrot.lane.b32.xlu1 %v302_v10, %s2780_s20  ;;  %352 = vrot.lane.b32.xlu0 %v310_v16, %s2783_s23 }
  0x34   : > { %360 = vrot.lane.b32.xlu2 %v312_v19, %s2786_s26 }
  0x3b   : > { %368 = vrot.lane.b32.xlu1 %v314_v21, %s2785_s25  ;;  %364 = vrot.lane.b32.xlu0 %v306_v17, %s2782_s22 }
  0x3c   : > { %401 = vrot.lane.b32.xlu2 %v2837_v2, %s2787_s27 }
  0x43   : > { %405 = vrot.lane.b32.xlu1 %v2840_v3, %s2787_s27  ;;  %403 = vrot.lane.b32.xlu0 %v2867_v18, %s2787_s27 }
  0x44   : > { %407 = vrot.lane.b32.xlu2 %v2876_v24, %s2787_s27 }
  0x4b   : > { %411 = vrot.lane.b32.xlu1 %v2855_v13, %s2787_s27  ;;  %409 = vrot.lane.b32.xlu0 %v2843_v4, %s2787_s27 }
  0x4c   : > { %413 = vrot.lane.b32.xlu2 %v2848_v6, %s2787_s27 }
  0x53   : > { %727 = vrot.lane.b32.xlu1 %v2867_v18, %s2788_s28  ;;  %415 = vrot.lane.b32.xlu0 %v2858_v14, %s2787_s27 }
  0x54   : > { %729 = vrot.lane.b32.xlu2 %v2840_v3, %s2788_s28 }
  0x5b   : > { %733 = vrot.lane.b32.xlu1 %v2843_v4, %s2788_s28  ;;  %725 = vrot.lane.b32.xlu0 %v2837_v2, %s2788_s28 }
  0x5c   : > { %735 = vrot.lane.b32.xlu2 %v2855_v13, %s2788_s28 }
  0x63   : > { %739 = vrot.lane.b32.xlu1 %v2858_v14, %s2788_s28  ;;  %731 = vrot.lane.b32.xlu0 %v2876_v24, %s2788_s28 }
  0x6b   : > { %737 = vrot.lane.b32.xlu0 %v2848_v6, %s2788_s28 }
  0x76   : > { %v337_v18 = vpop.permute.xlu2 %336 }
  0x7e   : > { %v349_v3 = vpop.permute.xlu2 %348 }
  0x86   : > { %v333_v4 = vpop.permute.xlu2 %332 }
  0x8d   : > { %v329_v22 = vpop.permute.xlu1 %328  ;;  %v321_v23 = vpop.permute.xlu0 %320 }
  0x8e   : > { %v361_v14 = vpop.permute.xlu2 %360 }
  0x95   : > { %v325_v2 = vpop.permute.xlu1 %324  ;;  %v317_v26 = vpop.permute.xlu0 %316 }
  0x96   : > { %v372_v13 = vsel %vm371_vm1, %v2896_v43, %v317_v26  ;;  %v402_v33 = vpop.permute.xlu2 %401 }
  0x97   : > { %v374_v24 = vsel %vm373_vm2, %v372_v13, %v321_v23  ;;  %v427_v51 = vrot.slane %v402_v33, 4 }
  0x98   : > { %v376_v6 = vsel %vm375_vm3, %v374_v24, %v325_v2 }
  0x99   : > { %v378_v27 = vsel %vm377_vm4, %v376_v6, %v329_v22 }
  0x9a   : > { %v380_v28 = vsel %vm379_vm5, %v378_v27, %v333_v4 }
  0x9b   : > { %v382_v31 = vsel %vm381_vm6, %v380_v28, %v337_v18 }
  0x9d   : > { %v345_v29 = vpop.permute.xlu1 %344  ;;  %v341_v30 = vpop.permute.xlu0 %340 }
  0x9e   : > { %v384_v32 = vsel %vm383_vm7, %v382_v31, %v341_v30  ;;  %v385_v34 = vsel %vm371_vm1, %v2911_v55, %v345_v29  ;;  %v408_v40 = vpop.permute.xlu2 %407 }
  0x9f   : > { %2674 = vmatpush.msk.msra.mxu2 %vm613_vm8, %v384_v32  ;;  %v386_v35 = vsel %vm373_vm2, %v385_v34, %v349_v3  ;;  %v495_v8 = vrot.slane %v408_v40, 4 }
  0xa5   : > { %v357_v36 = vpop.permute.xlu1 %356  ;;  %v353_v37 = vpop.permute.xlu0 %352 }
  0xa6   : > { %v387_v38 = vsel %vm375_vm3, %v386_v35, %v353_v37  ;;  %v414_v46 = vpop.permute.xlu2 %413 }
  0xa7   : > { %v388_v39 = vsel %vm377_vm4, %v387_v38, %v357_v36  ;;  %v437_v53 = vrot.slane %v414_v46, 4 }
  0xa8   : > { %v389_v42 = vsel %vm379_vm5, %v388_v39, %v361_v14 }
  0xad   : > { %v369_v41 = vpop.permute.xlu1 %368  ;;  %v365_v43 = vpop.permute.xlu0 %364 }
  0xae   : > { %v390_v44 = vsel %vm381_vm6, %v389_v42, %v365_v43  ;;  %v730_v31 = vpop.permute.xlu2 %729 }
  0xaf   : > { %v391_v45 = vsel %vm383_vm7, %v390_v44, %v369_v41 }
  0xb0   : > { %2676 = vmatpush.msk.msra.mxu3 %vm613_vm8, %v391_v45  ;;  %v763_v45 = vrot.slane %v730_v31, 4 }
  0xb5   : > { %v406_v47 = vpop.permute.xlu1 %405  ;;  %v404_v48 = vpop.permute.xlu0 %403 }
  0xb6   : > { %v439_v49 = vrot.slane %v406_v47, 4  ;;  %v483_v54 = vrot.slane %v404_v48, 4  ;;  %v438_v61 = vsel %vm203_vm0, %v437_v53, %v406_v47  ;;  %v3052_v39 = vpop.permute.xlu2 %735 }
  0xb7   : > { %v3001_v9 = vperm.slane %v438_v61, %v2845_v5  ;;  %v805_v41 = vrot.slane %v3052_v39, 4 }
  0xb8   : > { %v440_v50 = vsel %vm203_vm0, %v414_v46, %v439_v49 }
  0xb9   : > { %v448_v52 = vperm.slane %v440_v50, %v2845_v5 }
  0xbb   : > { %v461_v57 = vrot.slane %v448_v52, 4 }
  0xbd   : > { %v412_v55 = vpop.permute.xlu1 %411  ;;  %v410_v56 = vpop.permute.xlu0 %409 }
  0xbe   : > { %v481_v58 = vrot.slane %v412_v55, 4  ;;  %v425_v59 = vrot.slane %v410_v56, 4  ;;  %v428_v60 = vsel %vm203_vm0, %v410_v56, %v427_v51  ;;  %v484_v63 = vsel %vm203_vm0, %v412_v55, %v483_v54 }
  0xbf   : > { %v436_v62 = vperm.slane %v428_v60, %v2845_v5  ;;  %v492_v12 = vperm.slane %v484_v63, %v2845_v5 }
  0xc0   : > { %v426_v0 = vsel %vm203_vm0, %v425_v59, %v402_v33  ;;  %v482_v10 = vsel %vm203_vm0, %v481_v58, %v404_v48 }
  0xc1   : > { %v2998_v1 = vperm.slane %v426_v0, %v2845_v5  ;;  %v463_v7 = vrot.slane %v436_v62, 4  ;;  %v462_v11 = vsel %vm203_vm0, %v461_v57, %v436_v62  ;;  %v3015_v20 = vperm.slane %v482_v10, %v2845_v5 }
  0xc2   : > { %v3007_v15 = vperm.slane %v462_v11, %v2878_v25  ;;  %v519_v2 = vrot.slane %v492_v12, 4 }
  0xc3   : > { %v464_v16 = vsel %vm203_vm0, %v448_v52, %v463_v7  ;;  %v451_v17 = vrot.slane %v2998_v1, 4  ;;  %v507_v27 = vrot.slane %v3015_v20, 4  ;;  %v449_v7 = vrot.slane %v3001_v9, 4 }
  0xc4   : > { %v3012_v19 = vperm.slane %v464_v16, %v2878_v25  ;;  %550 = vrot.lane.b32.xlu1 %v3007_v15, %s2780_s20 }
  0xc5   : > { %v3019_v21 = vpop.permute.xlu1 %727  ;;  %v416_v18 = vpop.permute.xlu0 %415  ;;  %v452_v3 = vsel %vm203_vm0, %v3001_v9, %v451_v17  ;;  %v450_v9 = vsel %vm203_vm0, %v449_v7, %v2998_v1  ;;  %v477_v17 = vrot.slane %v3007_v15, 4 }
  0xc6   : > { %v493_v22 = vrot.slane %v416_v18, 4  ;;  %v496_v23 = vsel %vm203_vm0, %v416_v18, %v495_v8  ;;  %558 = vrot.lane.b32.xlu0 %v3012_v19, %s2782_s22  ;;  %v3027_v4 = vperm.slane %v452_v3, %v2878_v25  ;;  %v806_v48 = vsel %vm203_vm0, %v805_v41, %v3019_v21 }
  0xc7   : > { %v504_v26 = vperm.slane %v496_v23, %v2845_v5  ;;  %v812_v54 = vperm.slane %v806_v48, %v2845_v5  ;;  %v3099_v23 = vperm.slane %v450_v9, %v2878_v25 }
  0xc8   : > { %v494_v13 = vsel %vm203_vm0, %v493_v22, %v408_v40  ;;  %542 = vrot.lane.b32.xlu2 %v3027_v4, %s2781_s21  ;;  %v475_v18 = vrot.slane %v3027_v4, 4 }
  0xc9   : > { %v500_v14 = vperm.slane %v494_v13, %v2845_v5  ;;  %v517_v24 = vrot.slane %v504_v26, 4  ;;  %v520_v6 = vsel %vm203_vm0, %v504_v26, %v519_v2  ;;  %v831_v11 = vrot.slane %v812_v54, 4 }
  0xca   : > { %v3037_v28 = vperm.slane %v520_v6, %v2878_v25  ;;  %v478_v2 = vsel %vm203_vm0, 0.0, %v477_v17  ;;  %v476_v1 = vsel %vm203_vm0, 0.0, %v475_v18  ;;  %v473_v4 = vrot.slane %v3099_v23, 4 }
  0xcb   : > { %v508_v29 = vsel %vm203_vm0, %v500_v14, %v507_v27  ;;  %v518_v30 = vsel %vm203_vm0, %v517_v24, %v492_v12  ;;  %v505_v12 = vrot.slane %v500_v14, 4 }
  0xcc   : > { %v3042_v32 = vperm.slane %v508_v29, %v2878_v25  ;;  %586 = vrot.lane.b32.xlu1 %v3037_v28, %s2782_s22  ;;  %v524_v34 = vperm.slane %v518_v30, %v2878_v25  ;;  %v474_v13 = vsel %vm203_vm0, 0.0, %v473_v4  ;;  %v479_v29 = vrot.slane %v3012_v19, 4  ;;  %v3128_v19 = vld [vmem:[%s2834_s19 + $0x49] sm:$0xff] }
  0xcd   : > { %v726_v33 = vpop.permute.xlu0 %725  ;;  %v734_v35 = vpop.permute.xlu1 %733  ;;  %v506_v22 = vsel %vm203_vm0, %v505_v12, %v3015_v20  ;;  %v535_v30 = vrot.slane %v3037_v28, 4 }
  0xce   : > { %570 = vrot.lane.b32.xlu0 %v3042_v32, %s2781_s21  ;;  %v751_v36 = vrot.slane %v726_v33, 4  ;;  %v749_v38 = vrot.slane %v734_v35, 4  ;;  %v3106_v15 = vperm.slane %v506_v22, %v2878_v25  ;;  %v533_v26 = vrot.slane %v524_v34, 4 }
  0xd0   : > { %578 = vrot.lane.b32.xlu2 %v524_v34, %s2780_s20  ;;  %v752_v40 = vsel %vm203_vm0, %v734_v35, %v751_v36  ;;  %v750_v43 = vsel %vm203_vm0, %v749_v38, %v726_v33  ;;  %v529_v20 = vrot.slane %v3106_v15, 4  ;;  %v534_v24 = vsel %vm203_vm0, 0.0, %v533_v26 }
  0xd1   : > { %v760_v44 = vperm.slane %v752_v40, %v2845_v5  ;;  %v756_v47 = vperm.slane %v750_v43, %v2845_v5  ;;  %v807_v36 = vrot.slane %v3019_v21, 4  ;;  %v480_v38 = vsel %vm203_vm0, 0.0, %v479_v29  ;;  %v3142_v43 = vld [vmem:[%s2834_s19 + $0x31] sm:$0xff]  ;;  %v3202_v29 = vld [vmem:[%s2834_s19 + $0x39] sm:$0xff] }
  0xd2   : > { %v530_v14 = vsel %vm203_vm0, 0.0, %v529_v20  ;;  %v536_v40 = vsel %vm203_vm0, 0.0, %v535_v30  ;;  %v3207_v30 = vld [vmem:[%s2834_s19 + $0x21] sm:$0xff] }
  0xd3   : > { %v787_v53 = vrot.slane %v760_v44, 4  ;;  %v775_v57 = vrot.slane %v756_v47, 4 }
  0xd5   : > { %v3050_v37 = vpop.permute.xlu0 %731  ;;  %v3056_v42 = vpop.permute.xlu1 %739 }
  0xd6   : > { %v817_v46 = vrot.slane %v3056_v42, 4 }
  0xd8   : > { %v818_v55 = vsel %vm203_vm0, %v817_v46, %v3050_v37 }
  0xd9   : > { %v824_v62 = vperm.slane %v818_v55, %v2845_v5 }
  0xdb   : > { %v832_v16 = vsel %vm203_vm0, %v824_v62, %v831_v11  ;;  %v829_v6 = vrot.slane %v824_v62, 4 }
  0xdc   : > { %v3094_v3 = vperm.slane %v832_v16, %v2878_v25 }
  0xdd   : > { %v738_v49 = vpop.permute.xlu0 %737  ;;  %v830_v34 = vsel %vm203_vm0, %v829_v6, %v812_v54 }
  0xde   : > { %v761_v50 = vrot.slane %v738_v49, 4  ;;  %v764_v51 = vsel %vm203_vm0, %v738_v49, %v763_v45  ;;  %v3134_v41 = vperm.slane %v830_v34, %v2878_v25  ;;  %v1004_v45 = vrot.slane %v3128_v19, 4  ;;  %v3211_v34 = vld [vmem:[%s2834_s19 + $0x51] sm:$0xff] }
  0xdf   : > { %v772_v52 = vperm.slane %v764_v51, %v2845_v5 }
  0xe0   : > { %v762_v56 = vsel %vm203_vm0, %v761_v50, %v730_v31  ;;  %v819_v31 = vrot.slane %v3050_v37, 4  ;;  %v853_v48 = vrot.slane %v3134_v41, 4  ;;  %v992_v50 = vrot.slane %v3142_v43, 4 }
  0xe1   : > { %v768_v58 = vperm.slane %v762_v56, %v2845_v5  ;;  %v785_v59 = vrot.slane %v772_v52, 4  ;;  %v788_v60 = vsel %vm203_vm0, %v772_v52, %v787_v53  ;;  %v3157_v52 = vld [vmem:[%s2834_s19 + $0x1] sm:$0xff] }
  0xe2   : > { %v3073_v61 = vperm.slane %v788_v60, %v2878_v25  ;;  %v820_v28 = vsel %vm203_vm0, %v3056_v42, %v819_v31  ;;  %v531_v42 = vrot.slane %v3042_v32, 4  ;;  %v854_v54 = vsel %vm203_vm0, 0.0, %v853_v48 }
  0xe3   : > { %v786_v63 = vsel %vm203_vm0, %v785_v59, %v760_v44  ;;  %v776_v0 = vsel %vm203_vm0, %v768_v58, %v775_v57  ;;  %v773_v27 = vrot.slane %v768_v58, 4  ;;  %v808_v44 = vsel %vm203_vm0, %v3052_v39, %v807_v36 }
  0xe4   : > { %882 = vrot.lane.b32.xlu1 %v3073_v61, %s2782_s22  ;;  %v792_v8 = vperm.slane %v786_v63, %v2878_v25  ;;  %v3083_v10 = vperm.slane %v776_v0, %v2878_v25  ;;  %v828_v46 = vperm.slane %v820_v28, %v2845_v5  ;;  %v816_v51 = vperm.slane %v808_v44, %v2845_v5 }
  0xe5   : > { %v774_v35 = vsel %vm203_vm0, %v773_v27, %v756_v47  ;;  %v3150_v47 = vld [vmem:[%s2834_s19 + $0x19] sm:$0xff]  ;;  %v532_v39 = vsel %vm203_vm0, 0.0, %v531_v42  ;;  %v993_v56 = vsel %vm203_vm0, %v992_v50, %v3157_v52  ;;  %v803_v63 = vrot.slane %v3073_v61, 4 }
  0xe6   : > { %874 = vrot.lane.b32.xlu2 %v792_v8, %s2780_s20  ;;  %866 = vrot.lane.b32.xlu0 %v3083_v10, %s2781_s21  ;;  %v801_v33 = vrot.slane %v792_v8, 4  ;;  %v3137_v21 = vperm.slane %v774_v35, %v2878_v25  ;;  %v1005_v32 = vsel %vm203_vm0, %v1004_v45, %v3150_v47  ;;  %v841_v53 = vrot.slane %v828_v46, 4 }
  0xe7   : > { %v843_v57 = vrot.slane %v816_v51, 4  ;;  %v1011_v58 = vperm.slane %v1005_v32, %v2845_v5  ;;  %v799_v59 = vrot.slane %v3083_v10, 4  ;;  %v999_v62 = vperm.slane %v993_v56, %v2845_v5 }
  0xe8   : > { %v802_v37 = vsel %vm203_vm0, 0.0, %v801_v33  ;;  %v797_v49 = vrot.slane %v3137_v21, 4  ;;  %v842_v60 = vsel %vm203_vm0, %v841_v53, %v816_v51  ;;  %v804_v16 = vsel %vm203_vm0, 0.0, %v803_v63 }
  0xe9   : > { %v844_v0 = vsel %vm203_vm0, %v828_v46, %v843_v57  ;;  %v1016_v7 = vrot.slane %v1011_v58, 4  ;;  %v800_v8 = vsel %vm203_vm0, 0.0, %v799_v59  ;;  %v848_v11 = vperm.slane %v842_v60, %v2878_v25 }
  0xea   : > { %v798_v55 = vsel %vm203_vm0, 0.0, %v797_v49  ;;  %v1018_v12 = vrot.slane %v999_v62, 4  ;;  %v852_v10 = vperm.slane %v844_v0, %v2878_v25  ;;  %v1006_v9 = vrot.slane %v3150_v47, 4 }
  0xeb   : > { %v1017_v61 = vsel %vm203_vm0, %v1016_v7, %v999_v62  ;;  %v857_v17 = vrot.slane %v848_v11, 4  ;;  %v994_v22 = vrot.slane %v3157_v52, 4  ;;  %v1048_v35 = vrot.slane %v3202_v29, 4 }
  0xec   : > { %894 = vrot.lane.b32.xlu1 %v3094_v3, %s2781_s21  ;;  %v1019_v18 = vsel %vm203_vm0, %v1011_v58, %v1018_v12  ;;  %v3188_v4 = vperm.slane %v1017_v61, %v2878_v25  ;;  %v1007_v20 = vsel %vm203_vm0, %v3128_v19, %v1006_v9  ;;  %v1062_v28 = vrot.slane %v3207_v30, 4 }
  0xed   : > { %v858_v26 = vsel %vm203_vm0, 0.0, %v857_v17  ;;  %v1015_v27 = vperm.slane %v1007_v20, %v2845_v5  ;;  %v1060_v42 = vrot.slane %v3211_v34, 4 }
  0xee   : > { %554 = vrot.lane.b32.xlu2 %v478_v2, %s2786_s26  ;;  %546 = vrot.lane.b32.xlu0 %v476_v1, %s2783_s23  ;;  %v859_v2 = vrot.slane %v852_v10, 4  ;;  %v855_v1 = vrot.slane %v3094_v3, 4  ;;  %v1040_v6 = vrot.slane %v3188_v4, 4  ;;  %v1063_v49 = vsel %vm203_vm0, %v3211_v34, %v1062_v28 }
  0xef   : > { %v1071_v53 = vperm.slane %v1063_v49, %v2845_v5 }
  0xf0   : > { %v856_v3 = vsel %vm203_vm0, 0.0, %v855_v1  ;;  %v1041_v36 = vsel %vm203_vm0, 0.0, %v1040_v6 }
  0xf1   : > { %v1084_v59 = vrot.slane %v1071_v53, 4 }
  0xf4   : > { %538 = vrot.lane.b32.xlu1 %v474_v13, %s2784_s24  ;;  %v1027_v13 = vperm.slane %v1019_v18, %v2878_v25 }
  0xf6   : > { %566 = vrot.lane.b32.xlu2 %v530_v14, %s2784_s24  ;;  %582 = vrot.lane.b32.xlu0 %v534_v24, %s2786_s26  ;;  %v995_v14 = vsel %vm203_vm0, %v3142_v43, %v994_v22  ;;  %v860_v24 = vsel %vm203_vm0, 0.0, %v859_v2  ;;  %v1042_v31 = vrot.slane %v1027_v13, 4 }
  0xf7   : > { %v1003_v33 = vperm.slane %v995_v14, %v2845_v5 }
  0xf9   : > { %v1030_v44 = vrot.slane %v1003_v33, 4 }
  0xfb   : > { %v1031_v50 = vsel %vm203_vm0, %v1015_v27, %v1030_v44 }
  0xfc   : > { %562 = vrot.lane.b32.xlu1 %v480_v38, %s2785_s25  ;;  %v1028_v38 = vrot.slane %v1015_v27, 4 }
  0xfe   : > { %590 = vrot.lane.b32.xlu2 %v536_v40, %s2785_s25  ;;  %878 = vrot.lane.b32.xlu0 %v802_v37, %s2786_s26  ;;  %v3216_v40 = vld [vmem:[%s2834_s19 + $0x9] sm:$0xff]  ;;  %v1043_v37 = vsel %vm203_vm0, 0.0, %v1042_v31  ;;  %v1029_v46 = vsel %vm203_vm0, %v1028_v38, %v1003_v33 }
  0xff   : > { %v1049_v45 = vsel %vm203_vm0, %v1048_v35, %v3216_v40  ;;  %v1050_v48 = vrot.slane %v3216_v40, 4  ;;  %v1035_v32 = vperm.slane %v1029_v46, %v2878_v25 }
 0x100   : > { %v1055_v51 = vperm.slane %v1049_v45, %v2845_v5 }
 0x101   : > { %v1044_v0 = vrot.slane %v1035_v32, 4 }
 0x102   : > { %v1074_v57 = vrot.slane %v1055_v51, 4 }
 0x104   : > { %574 = vrot.lane.b32.xlu1 %v532_v39, %s2783_s23  ;;  %v1061_v39 = vsel %vm203_vm0, %v1060_v42, %v3207_v30 }
 0x105   : > { %v1067_v56 = vperm.slane %v1061_v39, %v2845_v5 }
 0x106   : > { %890 = vrot.lane.b32.xlu0 %v854_v54, %s2784_s24  ;;  %862 = vrot.lane.b32.xlu2 %v798_v55, %s2784_s24  ;;  %v1051_v54 = vsel %vm203_vm0, %v3202_v29, %v1050_v48  ;;  %v1039_v55 = vperm.slane %v1031_v50, %v2878_v25 }
 0x107   : > { %v1059_v58 = vperm.slane %v1051_v54, %v2845_v5  ;;  %v1072_v60 = vrot.slane %v1067_v56, 4  ;;  %v1075_v63 = vsel %vm203_vm0, %v1067_v56, %v1074_v57 }
 0x108   : > { %v1046_v62 = vrot.slane %v1039_v55, 4  ;;  %v1083_v12 = vperm.slane %v1075_v63, %v2878_v25 }
 0x109   : > { %v1085_v7 = vsel %vm203_vm0, %v1084_v59, %v1059_v58  ;;  %v1086_v1 = vrot.slane %v1059_v58, 4 }
 0x10a   : > { %v1098_v9 = vrot.slane %v1083_v12, 4 }
 0x10c   : > { %870 = vrot.lane.b32.xlu1 %v800_v8, %s2783_s23  ;;  %v1073_v8 = vsel %vm203_vm0, %v1072_v60, %v1055_v51  ;;  %v1099_v2 = vsel %vm203_vm0, 0.0, %v1098_v9 }
 0x10d   : > { %v3252_v61 = vperm.slane %v1073_v8, %v2878_v25 }
 0x10e   : > { %902 = vrot.lane.b32.xlu0 %v848_v11, %s2780_s20  ;;  %886 = vrot.lane.b32.xlu2 %v804_v16, %s2785_s25  ;;  %v1047_v11 = vsel %vm203_vm0, 0.0, %v1046_v62  ;;  %v1045_v16 = vsel %vm203_vm0, 0.0, %v1044_v0 }
 0x10f   : > { %v1096_v22 = vrot.slane %v3252_v61, 4 }
 0x114   : > { %906 = vrot.lane.b32.xlu1 %v858_v26, %s2786_s26  ;;  %v1097_v26 = vsel %vm203_vm0, 0.0, %v1096_v22 }
 0x116   : > { %914 = vrot.lane.b32.xlu0 %v860_v24, %s2785_s25  ;;  %898 = vrot.lane.b32.xlu2 %v856_v3, %s2783_s23 }
 0x11c   : > { %1105 = vrot.lane.b32.xlu1 %v1041_v36, %s2784_s24 }
 0x11e   : > { %1113 = vrot.lane.b32.xlu0 %v1043_v37, %s2783_s23  ;;  %910 = vrot.lane.b32.xlu2 %v852_v10, %s2782_s22  ;;  %v1091_v10 = vperm.slane %v1085_v7, %v2878_v25 }
 0x120   : > { %v1100_v18 = vrot.slane %v1091_v10, 4 }
 0x122   : > { %v543_v17 = vpop.permute.xlu2 %542  ;;  %v1101_v20 = vsel %vm203_vm0, 0.0, %v1100_v18 }
 0x124   : > { %1117 = vrot.lane.b32.xlu1 %v1035_v32, %s2780_s20 }
 0x126   : > { %1125 = vrot.lane.b32.xlu0 %v1039_v55, %s2782_s22  ;;  %1109 = vrot.lane.b32.xlu2 %v1027_v13, %s2781_s21  ;;  %v1087_v13 = vsel %vm203_vm0, %v1071_v53, %v1086_v1 }
 0x127   : > { %v1095_v24 = vperm.slane %v1087_v13, %v2878_v25 }
 0x129   : > { %v1102_v3 = vrot.slane %v1095_v24, 4 }
 0x12a   : > { %v579_v14 = vpop.permute.xlu2 %578 }
 0x12b   : > { %v1103_v27 = vsel %vm203_vm0, 0.0, %v1102_v3 }
 0x12c   : > { %1129 = vrot.lane.b32.xlu1 %v1047_v11, %s2785_s25 }
 0x12e   : > { %1137 = vrot.lane.b32.xlu0 %v1083_v12, %s2781_s21  ;;  %1121 = vrot.lane.b32.xlu2 %v1045_v16, %s2786_s26 }
 0x134   : > { %1141 = vrot.lane.b32.xlu1 %v1099_v2, %s2783_s23 }
 0x136   : > { %1149 = vrot.lane.b32.xlu0 %v1101_v20, %s2786_s26  ;;  %1133 = vrot.lane.b32.xlu2 %v1097_v26, %s2784_s24  ;;  %v551_v31 = vpop.permute.xlu1 %550 }
 0x138   : > { %v559_v33 = vpop.permute.xlu0 %558 }
 0x13c   : > { %1153 = vrot.lane.b32.xlu1 %v1095_v24, %s2782_s22 }
 0x13e   : > { %1243 = vrot.lane.b32.xlu0 %v3157_v52, %s2787_s27  ;;  %1145 = vrot.lane.b32.xlu2 %v1091_v10, %s2780_s20  ;;  %v587_v36 = vpop.permute.xlu1 %586 }
 0x140   : > { %v875_v6 = vpop.permute.xlu2 %874  ;;  %v571_v38 = vpop.permute.xlu0 %570 }
 0x144   : > { %1245 = vrot.lane.b32.xlu1 %v3216_v40, %s2787_s27 }
 0x146   : > { %1249 = vrot.lane.b32.xlu0 %v3207_v30, %s2787_s27  ;;  %1157 = vrot.lane.b32.xlu2 %v1103_v27, %s2785_s25 }
 0x148   : > { %v555_v35 = vpop.permute.xlu2 %554 }
 0x14c   : > { %1251 = vrot.lane.b32.xlu1 %v3142_v43, %s2787_s27 }
 0x14e   : > { %1255 = vrot.lane.b32.xlu0 %v3128_v19, %s2787_s27  ;;  %1247 = vrot.lane.b32.xlu2 %v3150_v47, %s2787_s27 }
 0x150   : > { %v567_v28 = vpop.permute.xlu2 %566 }
 0x154   : > { %1257 = vrot.lane.b32.xlu1 %v3211_v34, %s2787_s27 }
 0x156   : > { %v883_v37 = vpop.permute.xlu1 %882  ;;  %1253 = vrot.lane.b32.xlu2 %v3202_v29, %s2787_s27 }
 0x158   : > { %v591_v44 = vpop.permute.xlu2 %590  ;;  %v867_v42 = vpop.permute.xlu0 %866 }
 0x15e   : > { %v895_v45 = vpop.permute.xlu1 %894 }
 0x160   : > { %v863_v46 = vpop.permute.xlu2 %862  ;;  %v547_v48 = vpop.permute.xlu0 %546 }
 0x161   : > { %v917_v16 = vsel %vm371_vm1, %v3137_v21, %v863_v46 }
 0x166   : > { %v539_v49 = vpop.permute.xlu1 %538 }
 0x167   : > { %v593_v50 = vsel %vm371_vm1, %v3099_v23, %v539_v49  ;;  %v600_v23 = vsel %vm371_vm1, %v3106_v15, %v567_v28 }
 0x168   : > { %v594_v51 = vsel %vm373_vm2, %v593_v50, %v543_v17  ;;  %v583_v39 = vpop.permute.xlu0 %582  ;;  %v887_v53 = vpop.permute.xlu2 %886  ;;  %v601_v63 = vsel %vm373_vm2, %v600_v23, %v571_v38  ;;  %v918_v17 = vsel %vm373_vm2, %v917_v16, %v867_v42 }
 0x169   : > { %v595_v32 = vsel %vm375_vm3, %v594_v51, %v547_v48 }
 0x16a   : > { %v596_v54 = vsel %vm377_vm4, %v595_v32, %v551_v31 }
 0x16b   : > { %v597_v55 = vsel %vm379_vm5, %v596_v54, %v555_v35 }
 0x16c   : > { %v598_v57 = vsel %vm381_vm6, %v597_v55, %v559_v33 }
 0x16e   : > { %v563_v56 = vpop.permute.xlu1 %562 }
 0x16f   : > { %v599_v58 = vsel %vm383_vm7, %v598_v57, %v563_v56 }
 0x170   : > { %2670 = vmatpush.msk.msra.mxu0 %vm613_vm8, %v599_v58  ;;  %v879_v59 = vpop.permute.xlu0 %878  ;;  %v899_v60 = vpop.permute.xlu2 %898 }
 0x176   : > { %v575_v62 = vpop.permute.xlu1 %574 }
 0x177   : > { %v602_v0 = vsel %vm375_vm3, %v601_v63, %v575_v62 }
 0x178   : > { %v603_v7 = vsel %vm377_vm4, %v602_v0, %v579_v14  ;;  %v891_v8 = vpop.permute.xlu0 %890  ;;  %v911_v15 = vpop.permute.xlu2 %910 }
 0x179   : > { %v604_v11 = vsel %vm379_vm5, %v603_v7, %v583_v39  ;;  %v924_v18 = vsel %vm371_vm1, %v3134_v41, %v891_v8 }
 0x17a   : > { %v605_v12 = vsel %vm381_vm6, %v604_v11, %v587_v36  ;;  %v925_v21 = vsel %vm373_vm2, %v924_v18, %v895_v45 }
 0x17b   : > { %v606_v10 = vsel %vm383_vm7, %v605_v12, %v591_v44  ;;  %v926_v14 = vsel %vm375_vm3, %v925_v21, %v899_v60 }
 0x17c   : > { %2672 = vmatpush.msk.msra.mxu1 %vm613_vm8, %v606_v10 }
 0x17e   : > { %v871_v9 = vpop.permute.xlu1 %870 }
 0x17f   : > { %v919_v22 = vsel %vm375_vm3, %v918_v17, %v871_v9 }
 0x180   : > { %v920_v2 = vsel %vm377_vm4, %v919_v22, %v875_v6  ;;  %v903_v1 = vpop.permute.xlu0 %902  ;;  %v1110_v41 = vpop.permute.xlu2 %1109 }
 0x181   : > { %v921_v20 = vsel %vm379_vm5, %v920_v2, %v879_v59  ;;  %v927_v24 = vsel %vm377_vm4, %v926_v14, %v903_v1 }
 0x182   : > { %v922_v26 = vsel %vm381_vm6, %v921_v20, %v883_v37 }
 0x183   : > { %v923_v13 = vsel %vm383_vm7, %v922_v26, %v887_v53 }
 0x184   : > { %2679 = vmatpush.msk.msrb.mxu0 %vm613_vm8, %v923_v13 }
 0x186   : > { %v907_v3 = vpop.permute.xlu1 %906 }
 0x187   : > { %v928_v27 = vsel %vm379_vm5, %v927_v24, %v907_v3 }
 0x188   : > { %v915_v6 = vpop.permute.xlu0 %914  ;;  %v929_v31 = vsel %vm381_vm6, %v928_v27, %v911_v15  ;;  %v1122_v36 = vpop.permute.xlu2 %1121 }
 0x189   : > { %v930_v33 = vsel %vm383_vm7, %v929_v31, %v915_v6 }
 0x18a   : > { %2681 = vmatpush.msk.msrb.mxu1 %vm613_vm8, %v930_v33 }
 0x18e   : > { %v1106_v35 = vpop.permute.xlu1 %1105 }
 0x18f   : > { %v1160_v28 = vsel %vm371_vm1, %v3188_v4, %v1106_v35 }
 0x190   : > { %v1114_v38 = vpop.permute.xlu0 %1113  ;;  %v1161_v37 = vsel %vm373_vm2, %v1160_v28, %v1110_v41  ;;  %v1134_v48 = vpop.permute.xlu2 %1133 }
 0x191   : > { %v1162_v42 = vsel %vm375_vm3, %v1161_v37, %v1114_v38  ;;  %v1167_v4 = vsel %vm371_vm1, %v3252_v61, %v1134_v48 }
 0x196   : > { %v1118_v44 = vpop.permute.xlu1 %1117 }
 0x197   : > { %v1163_v45 = vsel %vm377_vm4, %v1162_v42, %v1118_v44 }
 0x198   : > { %v1126_v46 = vpop.permute.xlu0 %1125  ;;  %v1164_v49 = vsel %vm379_vm5, %v1163_v45, %v1122_v36  ;;  %v1146_v53 = vpop.permute.xlu2 %1145 }
 0x199   : > { %v1165_v50 = vsel %vm381_vm6, %v1164_v49, %v1126_v46 }
 0x19e   : > { %v1130_v51 = vpop.permute.xlu1 %1129 }
 0x19f   : > { %v1166_v39 = vsel %vm383_vm7, %v1165_v50, %v1130_v51 }
 0x1a0   : > { %2684 = vmatpush.msk.msrb.mxu2 %vm613_vm8, %v1166_v39  ;;  %v1138_v32 = vpop.permute.xlu0 %1137  ;;  %v1158_v59 = vpop.permute.xlu2 %1157 }
 0x1a1   : > { %v1168_v55 = vsel %vm373_vm2, %v1167_v4, %v1138_v32 }
 0x1a6   : > { %v1142_v54 = vpop.permute.xlu1 %1141 }
 0x1a7   : > { %v1169_v56 = vsel %vm375_vm3, %v1168_v55, %v1142_v54 }
 0x1a8   : > { %v1150_v57 = vpop.permute.xlu0 %1149  ;;  %v1170_v58 = vsel %vm377_vm4, %v1169_v56, %v1146_v53  ;;  %v1248_v7 = vpop.permute.xlu2 %1247 }
 0x1a9   : > { %v1171_v23 = vsel %vm379_vm5, %v1170_v58, %v1150_v57  ;;  %v1281_v11 = vrot.slane %v1248_v7, 4 }
 0x1ae   : > { %v1154_v60 = vpop.permute.xlu1 %1153 }
 0x1af   : > { %v1172_v62 = vsel %vm381_vm6, %v1171_v23, %v1154_v60 }
 0x1b0   : > { %v1244_v63 = vpop.permute.xlu0 %1243  ;;  %v1173_v0 = vsel %vm383_vm7, %v1172_v62, %v1158_v59  ;;  %v1254_v2 = vpop.permute.xlu2 %1253 }
 0x1b1   : > { %2686 = vmatpush.msk.msrb.mxu3 %vm613_vm8, %v1173_v0  ;;  %v1269_v16 = vrot.slane %v1244_v63, 4  ;;  %v1323_v41 = vrot.slane %v1254_v2, 4 }
 0x1b6   : > { %v1246_v61 = vpop.permute.xlu1 %1245 }
 0x1b7   : > { %v1324_v28 = vsel %vm203_vm0, %v1323_v41, %v1246_v61  ;;  %v1325_v55 = vrot.slane %v1246_v61, 4 }
 0x1b8   : > { %v1250_v8 = vpop.permute.xlu0 %1249  ;;  %v1330_v51 = vperm.slane %v1324_v28, %v2845_v5 }
 0x1b9   : > { %v1337_v46 = vrot.slane %v1250_v8, 4  ;;  %v1326_v60 = vsel %vm203_vm0, %v1254_v2, %v1325_v55 }
 0x1ba   : > { %v1349_v0 = vrot.slane %v1330_v51, 4  ;;  %v1334_v61 = vperm.slane %v1326_v60, %v2845_v5 }
 0x1be   : > { %v1252_v12 = vpop.permute.xlu1 %1251 }
 0x1bf   : > { %v1267_v10 = vrot.slane %v1252_v12, 4  ;;  %v1270_v17 = vsel %vm203_vm0, %v1252_v12, %v1269_v16 }
 0x1c0   : > { %v1256_v15 = vpop.permute.xlu0 %1255  ;;  %v1278_v26 = vperm.slane %v1270_v17, %v2845_v5 }
 0x1c1   : > { %v1268_v9 = vsel %vm203_vm0, %v1267_v10, %v1244_v63  ;;  %v1279_v18 = vrot.slane %v1256_v15, 4  ;;  %v1282_v22 = vsel %vm203_vm0, %v1256_v15, %v1281_v11  ;;  %v1361_v10 = vrot.slane %v1334_v61, 4 }
 0x1c2   : > { %v1274_v1 = vperm.slane %v1268_v9, %v2845_v5  ;;  %v1290_v20 = vperm.slane %v1282_v22, %v2845_v5  ;;  %v1305_v48 = vrot.slane %v1278_v26, 4 }
 0x1c3   : > { %v1280_v21 = vsel %vm203_vm0, %v1279_v18, %v1248_v7 }
 0x1c4   : > { %v1293_v13 = vrot.slane %v1274_v1, 4  ;;  %v1286_v14 = vperm.slane %v1280_v21, %v2845_v5  ;;  %v1303_v24 = vrot.slane %v1290_v20, 4  ;;  %v1306_v56 = vsel %vm203_vm0, %v1290_v20, %v1305_v48 }
 0x1c5   : > { %v1314_v23 = vperm.slane %v1306_v56, %v2878_v25 }
 0x1c6   : > { %v1291_v3 = vrot.slane %v1286_v14, 4  ;;  %v1258_v27 = vpop.permute.xlu1 %1257  ;;  %v1294_v6 = vsel %vm203_vm0, %v1286_v14, %v1293_v13  ;;  %v1304_v31 = vsel %vm203_vm0, %v1303_v24, %v1278_v26  ;;  %v2669_v13 = vld [vmem:[%s3968_s1 + $0x8] sm:$0xff] }
 0x1c7   : > { %v1335_v33 = vrot.slane %v1258_v27, 4  ;;  %v1302_v35 = vperm.slane %v1294_v6, %v2878_v25  ;;  %v1310_v38 = vperm.slane %v1304_v31, %v2878_v25  ;;  %v1338_v4 = vsel %vm203_vm0, %v1258_v27, %v1337_v46  ;;  %2671 = vmatmul.msk.f32.vlgmr.msra.gmra.mxu0 %vm609_vm9, %v2669_v13  ;;  %2673 = vmatmul.msk.f32.vlgmr.msra.gmra.mxu1 %vm609_vm9, %v2669_v13 }
 0x1c8   : > { %v1292_v36 = vsel %vm203_vm0, %v1291_v3, %v1274_v1  ;;  %v1346_v57 = vperm.slane %v1338_v4, %v2845_v5  ;;  %v1321_v12 = vrot.slane %v1314_v23, 4 }
 0x1c9   : > { %v1336_v37 = vsel %vm203_vm0, %v1335_v33, %v1250_v8  ;;  %1384 = vrot.lane.b32.xlu0 %v1302_v35, %s2781_s21  ;;  %v1317_v44 = vrot.slane %v1302_v35, 4  ;;  %v3357_v42 = vperm.slane %v1292_v36, %v2878_v25  ;;  %v1319_v32 = vrot.slane %v1310_v38, 4 }
 0x1ca   : > { %v1342_v45 = vperm.slane %v1336_v37, %v2845_v5  ;;  %v1359_v62 = vrot.slane %v1346_v57, 4  ;;  %v1322_v9 = vsel %vm203_vm0, 0.0, %v1321_v12  ;;  %v1362_v17 = vsel %vm203_vm0, %v1346_v57, %v1361_v10 }
 0x1cb   : > { %v1318_v49 = vsel %vm203_vm0, 0.0, %v1317_v44  ;;  %v1315_v50 = vrot.slane %v3357_v42, 4  ;;  %v1320_v58 = vsel %vm203_vm0, 0.0, %v1319_v32  ;;  %v1370_v22 = vperm.slane %v1362_v17, %v2878_v25 }
 0x1cc   : > { %v1347_v39 = vrot.slane %v1342_v45, 4  ;;  %1388 = vrot.lane.b32.xlu1 %v1318_v49, %s2783_s23  ;;  %v1350_v7 = vsel %vm203_vm0, %v1342_v45, %v1349_v0  ;;  %v1360_v11 = vsel %vm203_vm0, %v1359_v62, %v1334_v61 }
 0x1cd   : > { %v1316_v53 = vsel %vm203_vm0, 0.0, %v1315_v50  ;;  %v1358_v16 = vperm.slane %v1350_v7, %v2878_v25  ;;  %v1366_v15 = vperm.slane %v1360_v11, %v2878_v25  ;;  %v1377_v20 = vrot.slane %v1370_v22, 4 }
 0x1ce   : > { %1380 = vrot.lane.b32.xlu2 %v1316_v53, %s2784_s24  ;;  %v1348_v54 = vsel %vm203_vm0, %v1347_v39, %v1330_v51 }
 0x1cf   : > { %v3372_v59 = vperm.slane %v1348_v54, %v2878_v25  ;;  %v1375_v18 = vrot.slane %v1366_v15, 4  ;;  %v1373_v2 = vrot.slane %v1358_v16, 4  ;;  %v1378_v26 = vsel %vm203_vm0, 0.0, %v1377_v20 }
 0x1d1   : > { %1396 = vrot.lane.b32.xlu0 %v1320_v58, %s2786_s26  ;;  %v1371_v63 = vrot.slane %v3372_v59, 4  ;;  %v1376_v1 = vsel %vm203_vm0, 0.0, %v1375_v18  ;;  %v1374_v21 = vsel %vm203_vm0, 0.0, %v1373_v2 }
 0x1d3   : > { %v1372_v8 = vsel %vm203_vm0, 0.0, %v1371_v63 }
 0x1d4   : > { %1400 = vrot.lane.b32.xlu1 %v1314_v23, %s2782_s22 }
 0x1d6   : > { %1392 = vrot.lane.b32.xlu2 %v1310_v38, %s2780_s20 }
 0x1d9   : > { %1408 = vrot.lane.b32.xlu0 %v1372_v8, %s2784_s24 }
 0x1dc   : > { %1412 = vrot.lane.b32.xlu1 %v1358_v16, %s2781_s21 }
 0x1de   : > { %1404 = vrot.lane.b32.xlu2 %v1322_v9, %s2785_s25 }
 0x1e1   : > { %1420 = vrot.lane.b32.xlu0 %v1366_v15, %s2780_s20 }
 0x1e4   : > { %1424 = vrot.lane.b32.xlu1 %v1376_v1, %s2786_s26 }
 0x1e6   : > { %1416 = vrot.lane.b32.xlu2 %v1374_v21, %s2783_s23 }
 0x1e9   : > { %1432 = vrot.lane.b32.xlu0 %v1378_v26, %s2785_s25 }
 0x1ec   : > { %1518 = vrot.lane.b32.xlu1 %v3157_v52, %s2788_s28  ;;  %v3415_v52 = vld [vmem:[%s2834_s19 + $0x4a] sm:$0xff] }
 0x1ee   : > { %1428 = vrot.lane.b32.xlu2 %v1370_v22, %s2782_s22 }
 0x1f1   : > { %1532 = vrot.lane.b32.xlu0 %v3211_v34, %s2788_s28  ;;  %v3418_v34 = vld [vmem:[%s2834_s19 + $0x52] sm:$0xff] }
 0x1f4   : > { %1522 = vrot.lane.b32.xlu1 %v3150_v47, %s2788_s28  ;;  %v3435_v47 = vld [vmem:[%s2834_s19 + $0x1a] sm:$0xff] }
 0x1f6   : > { %1530 = vrot.lane.b32.xlu2 %v3128_v19, %s2788_s28  ;;  %v3427_v19 = vld [vmem:[%s2834_s19 + $0x22] sm:$0xff] }
 0x1f9   : > { %1526 = vrot.lane.b32.xlu0 %v3142_v43, %s2788_s28  ;;  %v3430_v43 = vld [vmem:[%s2834_s19 + $0x32] sm:$0xff] }
 0x1fc   : > { %1528 = vrot.lane.b32.xlu1 %v3202_v29, %s2788_s28  ;;  %v3440_v29 = vld [vmem:[%s2834_s19 + $0x2] sm:$0xff] }
 0x1fe   : > { %1524 = vrot.lane.b32.xlu2 %v3207_v30, %s2788_s28  ;;  %v3445_v30 = vld [vmem:[%s2834_s19 + $0xa] sm:$0xff] }
 0x201   : > { %2048 = vrot.lane.b32.xlu0 %v3415_v52, %s2787_s27 }
 0x204   : > { %2050 = vrot.lane.b32.xlu1 %v3418_v34, %s2787_s27 }
 0x206   : > { %1520 = vrot.lane.b32.xlu2 %v3216_v40, %s2788_s28  ;;  %v3450_v40 = vld [vmem:[%s2834_s19 + $0x3a] sm:$0xff] }
 0x209   : > { %2042 = vrot.lane.b32.xlu0 %v3427_v19, %s2787_s27 }
 0x20c   : > { %2044 = vrot.lane.b32.xlu1 %v3430_v43, %s2787_s27 }
 0x20e   : > { %2040 = vrot.lane.b32.xlu2 %v3435_v47, %s2787_s27 }
 0x211   : > { %2036 = vrot.lane.b32.xlu0 %v3440_v29, %s2787_s27 }
 0x214   : > { %2038 = vrot.lane.b32.xlu1 %v3445_v30, %s2787_s27 }
 0x216   : > { %2046 = vrot.lane.b32.xlu2 %v3450_v40, %s2787_s27 }
 0x219   : > { %2325 = vrot.lane.b32.xlu0 %v3418_v34, %s2788_s28 }
 0x21c   : > { %2315 = vrot.lane.b32.xlu1 %v3435_v47, %s2788_s28 }
 0x21e   : > { %2323 = vrot.lane.b32.xlu2 %v3415_v52, %s2788_s28 }
 0x221   : > { %2319 = vrot.lane.b32.xlu0 %v3430_v43, %s2788_s28 }
 0x224   : > { %2321 = vrot.lane.b32.xlu1 %v3450_v40, %s2788_s28 }
 0x226   : > { %2317 = vrot.lane.b32.xlu2 %v3427_v19, %s2788_s28 }
 0x228   : > { %v1381_v14 = vpop.permute.xlu2 %1380 }
 0x229   : > { %2313 = vrot.lane.b32.xlu0 %v3445_v30, %s2788_s28  ;;  %v1435_v27 = vsel %vm371_vm1, %v3357_v42, %v1381_v14 }
 0x22e   : > { %2311 = vrot.lane.b32.xlu2 %v3440_v29, %s2788_s28 }
 0x230   : > { %v1393_v24 = vpop.permute.xlu2 %1392 }
 0x238   : > { %v1405_v31 = vpop.permute.xlu2 %1404 }
 0x23b   : > { %v1385_v41 = vpop.permute.xlu0 %1384 }
 0x23c   : > { %v1436_v6 = vsel %vm373_vm2, %v1435_v27, %v1385_v41 }
 0x23e   : > { %v1389_v3 = vpop.permute.xlu1 %1388 }
 0x23f   : > { %v1437_v33 = vsel %vm375_vm3, %v1436_v6, %v1389_v3 }
 0x240   : > { %v1438_v36 = vsel %vm377_vm4, %v1437_v33, %v1393_v24  ;;  %v1417_v46 = vpop.permute.xlu2 %1416 }
 0x243   : > { %v1397_v35 = vpop.permute.xlu0 %1396 }
 0x244   : > { %v1439_v38 = vsel %vm379_vm5, %v1438_v36, %v1397_v35 }
 0x246   : > { %v1401_v28 = vpop.permute.xlu1 %1400 }
 0x247   : > { %v1440_v37 = vsel %vm381_vm6, %v1439_v38, %v1401_v28 }
 0x248   : > { %v1441_v44 = vsel %vm383_vm7, %v1440_v37, %v1405_v31  ;;  %v1429_v51 = vpop.permute.xlu2 %1428 }
 0x249   : > { %2689 = vmatpush.msk.msra.mxu0 %vm613_vm8, %v1441_v44 }
 0x24b   : > { %v1409_v45 = vpop.permute.xlu0 %1408 }
 0x24c   : > { %v1442_v48 = vsel %vm371_vm1, %v3372_v59, %v1409_v45 }
 0x24e   : > { %v1413_v42 = vpop.permute.xlu1 %1412 }
 0x24f   : > { %v1443_v49 = vsel %vm373_vm2, %v1442_v48, %v1413_v42 }
 0x250   : > { %v1444_v39 = vsel %vm375_vm3, %v1443_v49, %v1417_v46  ;;  %v1531_v57 = vpop.permute.xlu2 %1530 }
 0x251   : > { %v1554_v23 = vrot.slane %v1531_v57, 4 }
 0x253   : > { %v1421_v50 = vpop.permute.xlu0 %1420 }
 0x254   : > { %v1445_v4 = vsel %vm377_vm4, %v1444_v39, %v1421_v50 }
 0x256   : > { %v1425_v32 = vpop.permute.xlu1 %1424 }
 0x257   : > { %v1446_v53 = vsel %vm379_vm5, %v1445_v4, %v1425_v32  ;;  %v1797_v4 = vrot.slane %v3415_v52, 4 }
 0x258   : > { %v1447_v55 = vsel %vm381_vm6, %v1446_v53, %v1429_v51  ;;  %v1525_v63 = vpop.permute.xlu2 %1524 }
 0x259   : > { %v1612_v36 = vrot.slane %v1525_v63, 4 }
 0x25b   : > { %v1433_v54 = vpop.permute.xlu0 %1432 }
 0x25c   : > { %v1448_v56 = vsel %vm383_vm7, %v1447_v55, %v1433_v54 }
 0x25d   : > { %2691 = vmatpush.msk.msra.mxu1 %vm613_vm8, %v1448_v56 }
 0x25e   : > { %v1519_v58 = vpop.permute.xlu1 %1518 }
 0x25f   : > { %v1544_v2 = vrot.slane %v1519_v58, 4 }
 0x260   : > { %v1521_v1 = vpop.permute.xlu2 %1520 }
 0x261   : > { %v1600_v48 = vrot.slane %v1521_v1, 4 }
 0x263   : > { %v1533_v59 = vpop.permute.xlu0 %1532 }
 0x264   : > { %v1610_v62 = vrot.slane %v1533_v59, 4  ;;  %v1613_v50 = vsel %vm203_vm0, %v1533_v59, %v1612_v36 }
 0x265   : > { %v1621_v53 = vperm.slane %v1613_v50, %v2845_v5 }
 0x266   : > { %v1523_v60 = vpop.permute.xlu1 %1522  ;;  %v1611_v7 = vsel %vm203_vm0, %v1610_v62, %v1525_v63 }
 0x267   : > { %v1555_v0 = vsel %vm203_vm0, %v1554_v23, %v1523_v60  ;;  %v1556_v61 = vrot.slane %v1523_v60, 4  ;;  %v1617_v16 = vperm.slane %v1611_v7, %v2845_v5  ;;  %v1785_v23 = vrot.slane %v3430_v43, 4 }
 0x268   : > { %v1561_v8 = vperm.slane %v1555_v0, %v2845_v5  ;;  %v3541_v56 = vpop.permute.xlu2 %2040  ;;  %v1798_v60 = vsel %vm203_vm0, %v1797_v4, %v3435_v47  ;;  %v1634_v0 = vrot.slane %v1621_v53, 4 }
 0x269   : > { %v1557_v10 = vsel %vm203_vm0, %v1531_v57, %v1556_v61  ;;  %v1622_v14 = vrot.slane %v1617_v16, 4  ;;  %v3552_v63 = vperm.slane %v1798_v60, %v2845_v5 }
 0x26a   : > { %v1566_v17 = vrot.slane %v1561_v8, 4  ;;  %v3503_v20 = vperm.slane %v1557_v10, %v2845_v5 }
 0x26b   : > { %v1527_v11 = vpop.permute.xlu0 %1526 }
 0x26c   : > { %v1542_v12 = vrot.slane %v1527_v11, 4  ;;  %v1545_v24 = vsel %vm203_vm0, %v1527_v11, %v1544_v2  ;;  %v1578_v38 = vrot.slane %v3503_v20, 4 }
 0x26d   : > { %v3518_v28 = vperm.slane %v1545_v24, %v2845_v5 }
 0x26e   : > { %v1543_v15 = vsel %vm203_vm0, %v1542_v12, %v1519_v58  ;;  %v1529_v9 = vpop.permute.xlu1 %1528  ;;  %v1853_v12 = vrot.slane %v3418_v34, 4 }
 0x26f   : > { %v1549_v18 = vperm.slane %v1543_v15, %v2845_v5  ;;  %v1598_v22 = vrot.slane %v1529_v9, 4  ;;  %v1579_v32 = vsel %vm203_vm0, %v1578_v38, %v3518_v28  ;;  %v1601_v54 = vsel %vm203_vm0, %v1529_v9, %v1600_v48 }
 0x270   : > { %v1585_v57 = vperm.slane %v1579_v32, %v2878_v25  ;;  %v1609_v62 = vperm.slane %v1601_v54, %v2845_v5  ;;  %v1809_v9 = vrot.slane %v3552_v63, 4 }
 0x271   : > { %v1568_v21 = vrot.slane %v1549_v18, 4  ;;  %v1599_v26 = vsel %vm203_vm0, %v1598_v22, %v1521_v1  ;;  %v1567_v13 = vsel %vm203_vm0, %v1566_v17, %v1549_v18  ;;  %v3572_v1 = vpop.permute.xlu2 %2046 }
 0x272   : > { %v1605_v41 = vperm.slane %v1599_v26, %v2845_v5  ;;  %v3510_v3 = vperm.slane %v1567_v13, %v2878_v25  ;;  %v1594_v7 = vrot.slane %v1585_v57, 4  ;;  %v1635_v10 = vsel %vm203_vm0, %v1634_v0, %v1609_v62 }
 0x273   : > { %v1569_v27 = vsel %vm203_vm0, %v1561_v8, %v1568_v21  ;;  %v3539_v55 = vpop.permute.xlu0 %2048  ;;  %v1786_v8 = vsel %vm203_vm0, %v1785_v23, %v3440_v29  ;;  %v1636_v17 = vrot.slane %v1609_v62, 4  ;;  %v1641_v2 = vperm.slane %v1635_v10, %v2878_v25 }
 0x274   : > { %v1624_v6 = vrot.slane %v1605_v41, 4  ;;  %v1577_v31 = vperm.slane %v1569_v27, %v2878_v25  ;;  %v1590_v33 = vrot.slane %v3510_v3, 4  ;;  %v1623_v35 = vsel %vm203_vm0, %v1622_v14, %v1605_v41 }
 0x275   : > { %v3521_v37 = vperm.slane %v1623_v35, %v2878_v25  ;;  %v3564_v15 = vperm.slane %v1786_v8, %v2845_v5  ;;  %v1595_v18 = vsel %vm203_vm0, 0.0, %v1594_v7  ;;  %v1841_v21 = vrot.slane %v3450_v40, 4 }
 0x276   : > { %1659 = vrot.lane.b32.xlu0 %v1577_v31, %s2781_s21  ;;  %v1591_v44 = vsel %vm203_vm0, 0.0, %v1590_v33  ;;  %v1625_v45 = vsel %vm203_vm0, %v1617_v16, %v1624_v6  ;;  %v3529_v49 = vpop.permute.xlu1 %2050  ;;  %v1592_v59 = vrot.slane %v1577_v31, 4  ;;  %v1854_v26 = vsel %vm203_vm0, %v1853_v12, %v3427_v19 }
 0x277   : > { %1655 = vrot.lane.b32.xlu1 %v1591_v44, %s2784_s24  ;;  %v1646_v46 = vrot.slane %v3521_v37, 4  ;;  %v1633_v42 = vperm.slane %v1625_v45, %v2878_v25  ;;  %v2128_v16 = vrot.slane %v3529_v49, 4  ;;  %v1580_v13 = vrot.slane %v3518_v28, 4 }
 0x278   : > { %v1593_v61 = vsel %vm203_vm0, 0.0, %v1592_v59  ;;  %v2072_v14 = vrot.slane %v3539_v55, 4  ;;  %v1810_v41 = vsel %vm203_vm0, %v1809_v9, %v3564_v15  ;;  %v2116_v27 = vrot.slane %v3572_v1, 4 }
 0x279   : > { %v1647_v51 = vsel %vm203_vm0, 0.0, %v1646_v46  ;;  %v1648_v39 = vrot.slane %v1633_v42, 4  ;;  %v1637_v6 = vsel %vm203_vm0, %v1621_v53, %v1636_v17  ;;  %v1860_v31 = vperm.slane %v1854_v26, %v2845_v5 }
 0x27a   : > { %1683 = vrot.lane.b32.xlu2 %v1647_v51, %s2784_s24  ;;  %v1650_v35 = vrot.slane %v1641_v2, 4  ;;  %v1842_v36 = vsel %vm203_vm0, %v1841_v21, %v3445_v30  ;;  %v2073_v38 = vsel %vm203_vm0, %v2072_v14, %v3541_v56  ;;  %v1581_v28 = vsel %vm203_vm0, %v3503_v20, %v1580_v13 }
 0x27b   : > { %v1649_v58 = vsel %vm203_vm0, 0.0, %v1648_v39  ;;  %v3568_v22 = vpop.permute.xlu0 %2042  ;;  %v3598_v44 = vperm.slane %v1810_v41, %v2878_v25  ;;  %v1645_v46 = vperm.slane %v1637_v6, %v2878_v25  ;;  %v1848_v50 = vperm.slane %v1842_v36, %v2845_v5 }
 0x27c   : > { %v2129_v24 = vsel %vm203_vm0, %v2128_v16, %v3568_v22  ;;  %v1865_v51 = vrot.slane %v1860_v31, 4  ;;  %v2079_v39 = vperm.slane %v2073_v38, %v2845_v5  ;;  %v1651_v20 = vsel %vm203_vm0, 0.0, %v1650_v35 }
 0x27d   : > { %v3588_v33 = vperm.slane %v2129_v24, %v2845_v5  ;;  %v1589_v4 = vperm.slane %v1581_v28, %v2878_v25  ;;  %v1833_v53 = vrot.slane %v3598_v44, 4  ;;  %v1652_v8 = vrot.slane %v1645_v46, 4 }
 0x27e   : > { %1691 = vrot.lane.b32.xlu0 %v1649_v58, %s2783_s23  ;;  %v3557_v11 = vpop.permute.xlu1 %2044  ;;  %v1866_v59 = vsel %vm203_vm0, %v1865_v51, %v1848_v50  ;;  %v2084_v23 = vrot.slane %v2079_v39, 4  ;;  %v1811_v26 = vrot.slane %v3564_v15, 4  ;;  %v1867_v13 = vrot.slane %v1848_v50, 4 }
 0x27f   : > { %1687 = vrot.lane.b32.xlu1 %v1633_v42, %s2781_s21  ;;  %v2060_v42 = vrot.slane %v3557_v11, 4  ;;  %v2140_v32 = vrot.slane %v3588_v33, 4  ;;  %v1596_v60 = vrot.slane %v1589_v4, 4  ;;  %v1834_v0 = vsel %vm203_vm0, 0.0, %v1833_v53 }
 0x280   : > { %v3625_v7 = vperm.slane %v1866_v59, %v2878_v25  ;;  %v1653_v17 = vsel %vm203_vm0, 0.0, %v1652_v8  ;;  %v1868_v6 = vsel %vm203_vm0, %v1860_v31, %v1867_v13  ;;  %v1799_v35 = vrot.slane %v3435_v47, 4 }
 0x281   : > { %v1597_v16 = vsel %vm203_vm0, 0.0, %v1596_v60  ;;  %v1876_v28 = vperm.slane %v1868_v6, %v2878_v25  ;;  %v1855_v51 = vrot.slane %v3427_v19, 4  ;;  %v1843_v19 = vrot.slane %v3445_v30, 4 }
 0x282   : > { %1663 = vrot.lane.b32.xlu2 %v1593_v61, %s2783_s23  ;;  %v1889_v9 = vrot.slane %v3625_v7, 4 }
 0x283   : > { %v1891_v47 = vrot.slane %v1876_v28, 4 }
 0x284   : > { %v1890_v21 = vsel %vm203_vm0, 0.0, %v1889_v9 }
 0x286   : > { %1671 = vrot.lane.b32.xlu0 %v1595_v18, %s2786_s26  ;;  %v3600_v45 = vpop.permute.xlu1 %2038 }
 0x287   : > { %1667 = vrot.lane.b32.xlu1 %v1585_v57, %s2780_s20  ;;  %v2117_v48 = vsel %vm203_vm0, %v2116_v27, %v3600_v45  ;;  %v3615_v57 = vpop.permute.xlu0 %2036  ;;  %v1812_v27 = vsel %vm203_vm0, %v3552_v63, %v1811_v26  ;;  %v1800_v63 = vsel %vm203_vm0, %v3415_v52, %v1799_v35  ;;  %v2118_v59 = vrot.slane %v3600_v45, 4 }
 0x288   : > { %v2123_v54 = vperm.slane %v2117_v48, %v2845_v5  ;;  %v2061_v58 = vsel %vm203_vm0, %v2060_v42, %v3615_v57  ;;  %v1820_v38 = vperm.slane %v1812_v27, %v2878_v25  ;;  %v1787_v42 = vrot.slane %v3440_v29, 4 }
 0x289   : > { %v2067_v61 = vperm.slane %v2061_v58, %v2845_v5  ;;  %v3663_v48 = vperm.slane %v1800_v63, %v2845_v5  ;;  %v2130_v29 = vrot.slane %v3568_v22, 4  ;;  %v2119_v45 = vsel %vm203_vm0, %v3572_v1, %v2118_v59 }
 0x28a   : > { %1695 = vrot.lane.b32.xlu2 %v1641_v2, %s2780_s20  ;;  %v2141_v62 = vsel %vm203_vm0, %v2140_v32, %v2123_v54  ;;  %v2142_v31 = vrot.slane %v2123_v54, 4  ;;  %v1788_v50 = vsel %vm203_vm0, %v3430_v43, %v1787_v42  ;;  %v1892_v32 = vsel %vm203_vm0, 0.0, %v1891_v47 }
 0x28b   : > { %v3628_v12 = vperm.slane %v2141_v62, %v2878_v25  ;;  %v2085_v10 = vsel %vm203_vm0, %v2084_v23, %v2067_v61  ;;  %v2086_v14 = vrot.slane %v2067_v61, 4  ;;  %v1821_v53 = vrot.slane %v3663_v48, 4 }
 0x28c   : > { %v3638_v2 = vperm.slane %v2085_v10, %v2878_v25  ;;  %v2143_v52 = vsel %vm203_vm0, %v3588_v33, %v2142_v31  ;;  %v2131_v22 = vsel %vm203_vm0, %v3529_v49, %v2130_v29  ;;  %v2062_v49 = vrot.slane %v3615_v57, 4 }
 0x28d   : > { %v2164_v18 = vrot.slane %v3628_v12, 4  ;;  %v2087_v15 = vsel %vm203_vm0, %v2079_v39, %v2086_v14  ;;  %v2074_v39 = vrot.slane %v3541_v56, 4  ;;  %v2151_v43 = vperm.slane %v2143_v52, %v2878_v25 }
 0x28e   : > { %1703 = vrot.lane.b32.xlu0 %v1645_v46, %s2782_s22  ;;  %v2108_v41 = vrot.slane %v3638_v2, 4  ;;  %v2095_v46 = vperm.slane %v2087_v15, %v2878_v25  ;;  %v1856_v56 = vsel %vm203_vm0, %v3418_v34, %v1855_v51  ;;  %v3691_v34 = vperm.slane %v2131_v22, %v2845_v5  ;;  %v2316_v42 = vpop.permute.xlu1 %2315 }
 0x28f   : > { %1699 = vrot.lane.b32.xlu1 %v1651_v20, %s2786_s26  ;;  %v2165_v24 = vsel %vm203_vm0, 0.0, %v2164_v18  ;;  %v1835_v20 = vrot.slane %v1820_v38, 4  ;;  %v2075_v33 = vsel %vm203_vm0, %v3539_v55, %v2074_v39  ;;  %v1864_v30 = vperm.slane %v1856_v56, %v2845_v5  ;;  %v3722_v6 = vpop.permute.xlu0 %2325 }
 0x290   : > { %v2109_v36 = vsel %vm203_vm0, 0.0, %v2108_v41  ;;  %v1844_v23 = vsel %vm203_vm0, %v3450_v40, %v1843_v19  ;;  %v2083_v55 = vperm.slane %v2075_v33, %v2845_v5  ;;  %v2110_v62 = vrot.slane %v2095_v46, 4 }
 0x291   : > { %v1836_v54 = vsel %vm203_vm0, 0.0, %v1835_v20  ;;  %v1877_v61 = vrot.slane %v1864_v30, 4  ;;  %v2152_v8 = vrot.slane %v3691_v34, 4  ;;  %v2063_v57 = vsel %vm203_vm0, %v3557_v11, %v2062_v49 }
 0x292   : > { %1675 = vrot.lane.b32.xlu2 %v1589_v4, %s2782_s22  ;;  %v1796_v4 = vperm.slane %v1788_v50, %v2845_v5  ;;  %v2096_v40 = vrot.slane %v2083_v55, 4  ;;  %v2111_v10 = vsel %vm203_vm0, 0.0, %v2110_v62  ;;  %v2127_v9 = vperm.slane %v2119_v45, %v2845_v5 }
 0x293   : > { %v2071_v1 = vperm.slane %v2063_v57, %v2845_v5 }
 0x294   : > { %v1822_v58 = vsel %vm203_vm0, %v1821_v53, %v1796_v4  ;;  %v2154_v20 = vrot.slane %v2127_v9, 4 }
 0x295   : > { %v1828_v60 = vperm.slane %v1822_v58, %v2878_v25  ;;  %v2097_v26 = vsel %vm203_vm0, %v2096_v40, %v2071_v1 }
 0x296   : > { %1898 = vrot.lane.b32.xlu0 %v1834_v0, %s2784_s24  ;;  %v1852_v0 = vperm.slane %v1844_v23, %v2845_v5  ;;  %v3744_v56 = vpop.permute.xlu1 %2321 }
 0x297   : > { %1679 = vrot.lane.b32.xlu1 %v1597_v16, %s2785_s25  ;;  %v2166_v16 = vrot.slane %v2151_v43, 4  ;;  %v1837_v41 = vrot.slane %v1828_v60, 4  ;;  %v2320_v52 = vpop.permute.xlu0 %2319 }
 0x298   : > { %v1878_v18 = vsel %vm203_vm0, %v1877_v61, %v1852_v0  ;;  %v2335_v22 = vrot.slane %v2320_v52, 4 }
 0x299   : > { %v2167_v11 = vsel %vm203_vm0, 0.0, %v2166_v16  ;;  %v1884_v13 = vperm.slane %v1878_v18, %v2878_v25 }
 0x29a   : > { %1707 = vrot.lane.b32.xlu2 %v1653_v17, %s2785_s25  ;;  %v3710_v17 = vpop.permute.xlu2 %2323 }
 0x29b   : > { %v1893_v15 = vrot.slane %v1884_v13, 4  ;;  %v2347_v29 = vrot.slane %v3710_v17, 4 }
 0x29d   : > { %v1894_v63 = vsel %vm203_vm0, 0.0, %v1893_v15  ;;  %v2348_v19 = vsel %vm203_vm0, %v2347_v29, %v2316_v42 }
 0x29e   : > { %2201 = vrot.lane.b32.xlu0 %v2165_v24, %s2784_s24  ;;  %v2103_v24 = vperm.slane %v2097_v26, %v2878_v25  ;;  %v2354_v59 = vperm.slane %v2348_v19, %v2845_v5 }
 0x29f   : > { %1926 = vrot.lane.b32.xlu1 %v1890_v21, %s2784_s24  ;;  %v2153_v21 = vsel %vm203_vm0, %v2152_v8, %v2127_v9  ;;  %v2349_v9 = vrot.slane %v2316_v42, 4 }
 0x2a0   : > { %v2159_v14 = vperm.slane %v2153_v21, %v2878_v25  ;;  %v2112_v27 = vrot.slane %v2103_v24, 4 }
 0x2a2   : > { %2173 = vrot.lane.b32.xlu2 %v2109_v36, %s2784_s24  ;;  %v3724_v35 = vpop.permute.xlu2 %2317  ;;  %v1879_v36 = vrot.slane %v1852_v0, 4  ;;  %v2168_v51 = vrot.slane %v2159_v14, 4  ;;  %v2359_v0 = vrot.slane %v2354_v59, 4 }
 0x2a4   : > { %v1880_v31 = vsel %vm203_vm0, %v1864_v30, %v1879_v36  ;;  %v2169_v53 = vsel %vm203_vm0, 0.0, %v2168_v51  ;;  %v2391_v30 = vrot.slane %v3744_v56, 4 }
 0x2a5   : > { %v1888_v50 = vperm.slane %v1880_v31, %v2878_v25 }
 0x2a6   : > { %2177 = vrot.lane.b32.xlu0 %v2095_v46, %s2781_s21  ;;  %v2113_v46 = vsel %vm203_vm0, 0.0, %v2112_v27  ;;  %v2350_v27 = vsel %vm203_vm0, %v3710_v17, %v2349_v9  ;;  %v2405_v17 = vrot.slane %v3724_v35, 4 }
 0x2a7   : > { %1902 = vrot.lane.b32.xlu1 %v1820_v38, %s2781_s21  ;;  %v1823_v38 = vrot.slane %v1796_v4, 4  ;;  %v2098_v4 = vrot.slane %v2071_v1, 4  ;;  %v1895_v8 = vrot.slane %v1888_v50, 4 }
 0x2a9   : > { %v1824_v47 = vsel %vm203_vm0, %v3663_v48, %v1823_v38  ;;  %v2099_v33 = vsel %vm203_vm0, %v2083_v55, %v2098_v4  ;;  %v1896_v21 = vsel %vm203_vm0, 0.0, %v1895_v8 }
 0x2aa   : > { %1930 = vrot.lane.b32.xlu2 %v1876_v28, %s2781_s21  ;;  %v1838_v28 = vsel %vm203_vm0, 0.0, %v1837_v41  ;;  %v1832_v39 = vperm.slane %v1824_v47, %v2878_v25 }
 0x2ac   : > { %v1839_v48 = vrot.slane %v1832_v39, 4 }
 0x2ae   : > { %1934 = vrot.lane.b32.xlu0 %v1892_v32, %s2783_s23  ;;  %v2312_v32 = vpop.permute.xlu2 %2311  ;;  %v1840_v49 = vsel %vm203_vm0, 0.0, %v1839_v48 }
 0x2af   : > { %2205 = vrot.lane.b32.xlu1 %v2151_v43, %s2781_s21  ;;  %v2403_v43 = vrot.slane %v3722_v6, 4  ;;  %v2336_v45 = vsel %vm203_vm0, %v2335_v22, %v2312_v32  ;;  %v2337_v36 = vrot.slane %v2312_v32, 4 }
 0x2b0   : > { %v2342_v57 = vperm.slane %v2336_v45, %v2845_v5 }
 0x2b1   : > { %v2404_v58 = vsel %vm203_vm0, %v2403_v43, %v3724_v35  ;;  %v2338_v51 = vsel %vm203_vm0, %v2320_v52, %v2337_v36 }
 0x2b2   : > { %1906 = vrot.lane.b32.xlu2 %v1836_v54, %s2783_s23  ;;  %v2155_v54 = vsel %vm203_vm0, %v3691_v34, %v2154_v20  ;;  %v2410_v55 = vperm.slane %v2404_v58, %v2845_v5  ;;  %v2314_v34 = vpop.permute.xlu0 %2313  ;;  %v2360_v1 = vsel %vm203_vm0, %v2359_v0, %v2342_v57  ;;  %v2406_v20 = vsel %vm203_vm0, %v3722_v6, %v2405_v17 }
 0x2b3   : > { %v2163_v62 = vperm.slane %v2155_v54, %v2878_v25  ;;  %v2392_v61 = vsel %vm203_vm0, %v2391_v30, %v2314_v34  ;;  %v2346_v52 = vperm.slane %v2338_v51, %v2845_v5  ;;  %v2393_v19 = vrot.slane %v2314_v34, 4 }
 0x2b4   : > { %v2415_v40 = vrot.slane %v2410_v55, 4 }
 0x2b5   : > { %v2170_v16 = vrot.slane %v2163_v62, 4  ;;  %v2394_v30 = vsel %vm203_vm0, %v3744_v56, %v2393_v19 }
 0x2b6   : > { %1910 = vrot.lane.b32.xlu0 %v1828_v60, %s2780_s20  ;;  %v2107_v60 = vperm.slane %v2099_v33, %v2878_v25  ;;  %v2414_v33 = vperm.slane %v2406_v20, %v2845_v5 }
 0x2b7   : > { %2181 = vrot.lane.b32.xlu1 %v2111_v10, %s2783_s23  ;;  %v2398_v10 = vperm.slane %v2392_v61, %v2845_v5  ;;  %v2171_v26 = vsel %vm203_vm0, 0.0, %v2170_v16  ;;  %v2373_v16 = vrot.slane %v2346_v52, 4 }
 0x2b9   : > { %v2416_v41 = vsel %vm203_vm0, %v2415_v40, %v2398_v10 }
 0x2ba   : > { %2209 = vrot.lane.b32.xlu2 %v2167_v11, %s2783_s23  ;;  %v2361_v11 = vrot.slane %v2342_v57, 4 }
 0x2bc   : > { %v2362_v38 = vsel %vm203_vm0, %v2354_v59, %v2361_v11 }
 0x2bd   : > { %v2370_v47 = vperm.slane %v2362_v38, %v2878_v25 }
 0x2be   : > { %2213 = vrot.lane.b32.xlu0 %v2159_v14, %s2780_s20  ;;  %v2417_v14 = vrot.slane %v2398_v10, 4 }
 0x2bf   : > { %1938 = vrot.lane.b32.xlu1 %v1884_v13, %s2780_s20  ;;  %v2114_v13 = vrot.slane %v2107_v60, 4  ;;  %v2385_v59 = vrot.slane %v2370_v47, 4 }
 0x2c1   : > { %v2115_v15 = vsel %vm203_vm0, 0.0, %v2114_v13  ;;  %v2386_v45 = vsel %vm203_vm0, 0.0, %v2385_v59 }
 0x2c2   : > { %2185 = vrot.lane.b32.xlu2 %v2103_v24, %s2780_s20  ;;  %v3774_v24 = vperm.slane %v2360_v1, %v2878_v25 }
 0x2c4   : > { %v2383_v42 = vrot.slane %v3774_v24, 4 }
 0x2c6   : > { %2189 = vrot.lane.b32.xlu0 %v2113_v46, %s2786_s26  ;;  %v2358_v46 = vperm.slane %v2350_v27, %v2845_v5  ;;  %v2384_v35 = vsel %vm203_vm0, 0.0, %v2383_v42 }
 0x2c7   : > { %1914 = vrot.lane.b32.xlu1 %v1838_v28, %s2786_s26  ;;  %v3783_v28 = vperm.slane %v2416_v41, %v2878_v25 }
 0x2c8   : > { %v2371_v32 = vrot.slane %v2358_v46, 4  ;;  %v2374_v11 = vsel %vm203_vm0, %v2358_v46, %v2373_v16 }
 0x2ca   : > { %1942 = vrot.lane.b32.xlu2 %v1894_v63, %s2786_s26  ;;  %v2418_v63 = vsel %vm203_vm0, %v2410_v55, %v2417_v14  ;;  %v2372_v22 = vsel %vm203_vm0, %v2371_v32, %v2346_v52 }
 0x2cb   : > { %v2426_v29 = vperm.slane %v2418_v63, %v2878_v25  ;;  %v2378_v6 = vperm.slane %v2372_v22, %v2878_v25 }
 0x2cd   : > { %v2441_v48 = vrot.slane %v2426_v29, 4  ;;  %v2387_v34 = vrot.slane %v2378_v6, 4 }
 0x2ce   : > { %1946 = vrot.lane.b32.xlu0 %v1888_v50, %s2782_s22  ;;  %v392_v50 = vld [vmem:[%s3968_s1] sm:$0xff] }
 0x2cf   : > { %2217 = vrot.lane.b32.xlu1 %v2169_v53, %s2786_s26  ;;  %2677 = vmatmul.msk.f32.vlgmr.msra.gmra.mxu3 %vm609_vm9, %v392_v50  ;;  %v2442_v58 = vsel %vm203_vm0, 0.0, %v2441_v48  ;;  %v2388_v56 = vsel %vm203_vm0, 0.0, %v2387_v34 }
 0x2d0   : > { %2675 = vmatmul.msk.f32.vlgmr.msra.gmra.mxu2 %vm609_vm9, %v392_v50 }
 0x2d2   : > { %1918 = vrot.lane.b32.xlu2 %v1832_v39, %s2782_s22  ;;  %v2439_v39 = vrot.slane %v3783_v28, 4 }
 0x2d4   : > { %v3755_v23 = vpop.permute.xlu2 %1683  ;;  %v2440_v43 = vsel %vm203_vm0, 0.0, %v2439_v39 }
 0x2d5   : > { %v1717_v9 = vsel %vm371_vm1, %v3521_v37, %v3755_v23  ;;  %v2382_v37 = vperm.slane %v2374_v11, %v2878_v25 }
 0x2d6   : > { %1922 = vrot.lane.b32.xlu0 %v1840_v49, %s2785_s25  ;;  %v2427_v49 = vrot.slane %v2414_v33, 4 }
 0x2d7   : > { %2193 = vrot.lane.b32.xlu1 %v2107_v60, %s2782_s22  ;;  %v2389_v42 = vrot.slane %v2382_v37, 4 }
 0x2da   : > { %2221 = vrot.lane.b32.xlu2 %v2163_v62, %s2782_s22  ;;  %v2402_v62 = vperm.slane %v2394_v30, %v2845_v5  ;;  %v2683_v30 = vld [vmem:[%s3968_s1 + $0x18] sm:$0xff] }
 0x2db   : > { %2685 = vmatmul.msk.f32.vlgmr.msrb.gmra.mxu2 %vm609_vm9, %v2683_v30  ;;  %2687 = vmatmul.msk.f32.vlgmr.msrb.gmra.mxu3 %vm609_vm9, %v2683_v30 }
 0x2dc   : > { %v3768_v18 = vpop.permute.xlu2 %1663  ;;  %v2428_v0 = vsel %vm203_vm0, %v2427_v49, %v2402_v62  ;;  %v2429_v8 = vrot.slane %v2402_v62, 4 }
 0x2dd   : > { %v2434_v57 = vperm.slane %v2428_v0, %v2878_v25 }
 0x2de   : > { %2225 = vrot.lane.b32.xlu0 %v2171_v26, %s2785_s25  ;;  %v2430_v10 = vsel %vm203_vm0, %v2414_v33, %v2429_v8 }
 0x2df   : > { %1950 = vrot.lane.b32.xlu1 %v1896_v21, %s2785_s25  ;;  %v2443_v1 = vrot.slane %v2434_v57, 4  ;;  %v2438_v14 = vperm.slane %v2430_v10, %v2878_v25 }
 0x2e1   : > { %v2444_v27 = vsel %vm203_vm0, 0.0, %v2443_v1  ;;  %v2445_v50 = vrot.slane %v2438_v14, 4 }
 0x2e2   : > { %2197 = vrot.lane.b32.xlu2 %v2115_v15, %s2785_s25 }
 0x2e3   : > { %v2446_v32 = vsel %vm203_vm0, 0.0, %v2445_v50 }
 0x2e4   : > { %v3790_v31 = vpop.permute.xlu2 %1695 }
 0x2e6   : > { %2452 = vrot.lane.b32.xlu0 %v2370_v47, %s2781_s21 }
 0x2e7   : > { %2448 = vrot.lane.b32.xlu1 %v2384_v35, %s2784_s24 }
 0x2e8   : > { %v1660_v4 = vpop.permute.xlu0 %1659 }
 0x2e9   : > { %v1656_v53 = vpop.permute.xlu1 %1655 }
 0x2ea   : > { %2476 = vrot.lane.b32.xlu2 %v2440_v43, %s2784_s24  ;;  %v1710_v26 = vsel %vm371_vm1, %v3510_v3, %v1656_v53 }
 0x2eb   : > { %v1711_v23 = vsel %vm373_vm2, %v1710_v26, %v1660_v4 }
 0x2ec   : > { %v1676_v54 = vpop.permute.xlu2 %1675  ;;  %v1712_v38 = vsel %vm375_vm3, %v1711_v23, %v3768_v18  ;;  %v2390_v18 = vsel %vm203_vm0, 0.0, %v2389_v42 }
 0x2ee   : > { %2484 = vrot.lane.b32.xlu0 %v2442_v58, %s2783_s23 }
 0x2ef   : > { %2480 = vrot.lane.b32.xlu1 %v2426_v29, %s2781_s21 }
 0x2f0   : > { %v1692_v60 = vpop.permute.xlu0 %1691 }
 0x2f1   : > { %v1688_v55 = vpop.permute.xlu1 %1687 }
 0x2f2   : > { %2456 = vrot.lane.b32.xlu2 %v2386_v45, %s2783_s23  ;;  %v1718_v21 = vsel %vm373_vm2, %v1717_v9, %v1688_v55 }
 0x2f3   : > { %v1719_v41 = vsel %vm375_vm3, %v1718_v21, %v1692_v60 }
 0x2f4   : > { %v1708_v61 = vpop.permute.xlu2 %1707  ;;  %v1720_v3 = vsel %vm377_vm4, %v1719_v41, %v3790_v31 }
 0x2f6   : > { %2464 = vrot.lane.b32.xlu0 %v2388_v56, %s2786_s26 }
 0x2f7   : > { %2460 = vrot.lane.b32.xlu1 %v2378_v6, %s2780_s20  ;;  %v2678_v6 = vld [vmem:[%s3968_s1 + $0x10] sm:$0xff] }
 0x2f8   : > { %v1672_v5 = vpop.permute.xlu0 %1671  ;;  %2680 = vmatmul.msk.f32.vlgmr.msrb.gmra.mxu0 %vm609_vm9, %v2678_v6  ;;  %2682 = vmatmul.msk.f32.vlgmr.msrb.gmra.mxu1 %vm609_vm9, %v2678_v6 }
 0x2f9   : > { %v1668_v40 = vpop.permute.xlu1 %1667 }
 0x2fa   : > { %2488 = vrot.lane.b32.xlu2 %v2434_v57, %s2780_s20  ;;  %v1713_v63 = vsel %vm377_vm4, %v1712_v38, %v1668_v40  ;;  %v2693_v40 = vld [vmem:[%s3968_s1 + $0x28] sm:$0xff]  ;;  %v2703_v38 = vld [vmem:[%s3968_s1 + $0x38] sm:$0xff] }
 0x2fb   : > { %v1714_v31 = vsel %vm379_vm5, %v1713_v63, %v1672_v5 }
 0x2fc   : > { %v2174_v13 = vpop.permute.xlu2 %2173  ;;  %v1715_v29 = vsel %vm381_vm6, %v1714_v31, %v1676_v54 }
 0x2fd   : > { %v2228_v16 = vsel %vm371_vm1, %v3638_v2, %v2174_v13 }
 0x2fe   : > { %2496 = vrot.lane.b32.xlu0 %v2438_v14, %s2782_s22 }
 0x2ff   : > { %2492 = vrot.lane.b32.xlu1 %v2444_v27, %s2786_s26  ;;  %s2715_s26 = sshll.u32 %s3976_s12, 4 }
 0x300   : > { %v1704_v36 = vpop.permute.xlu0 %1703  ;;  %s192_s29 = scalar_lea.vmem %s3970_s3, %s2715_s26 }
 0x301   : > { %v1700_v15 = vpop.permute.xlu1 %1699 }
 0x302   : > { %v1721_v46 = vsel %vm379_vm5, %v1720_v3, %v1700_v15  ;;  %2468 = vrot.lane.b32.xlu2 %v2382_v37, %s2782_s22 }
 0x303   : > { %v1722_v25 = vsel %vm381_vm6, %v1721_v46, %v1704_v36  ;;  %v2698_v46 = vld [vmem:[%s3968_s1 + $0x30] sm:$0xff] }
 0x304   : > { %v3849_v17 = vpop.permute.xlu2 %1930  ;;  %v1723_v47 = vsel %vm383_vm7, %v1722_v25, %v1708_v61 }
 0x305   : > { %2696 = vmatpush.msk.msra.mxu3 %vm613_vm8, %v1723_v47 }
 0x306   : > { %2697 = vmatmul.msk.f32.vlgmr.msra.gmra.mxu3 %vm609_vm9, %v2693_v40 }
 0x307   : > { %2472 = vrot.lane.b32.xlu1 %v2390_v18, %s2785_s25 }
 0x308   : > { %v1899_v51 = vpop.permute.xlu0 %1898 }
 0x309   : > { %v1680_v39 = vpop.permute.xlu1 %1679  ;;  %v1953_v0 = vsel %vm371_vm1, %v3598_v44, %v1899_v51  ;;  %v2688_v44 = vld [vmem:[%s3968_s1 + $0x20] sm:$0xff] }
 0x30a   : > { %v1716_v35 = vsel %vm383_vm7, %v1715_v29, %v1680_v39  ;;  %2500 = vrot.lane.b32.xlu2 %v2446_v32, %s2785_s25  ;;  %2690 = vmatmul.msk.f32.vlgmr.msra.gmra.mxu0 %vm609_vm9, %v2688_v44 }
 0x30b   : > { %2694 = vmatpush.msk.msra.mxu2 %vm613_vm8, %v1716_v35  ;;  %2692 = vmatmul.msk.f32.vlgmr.msra.gmra.mxu1 %vm609_vm9, %v2688_v44 }
 0x30c   : > { %v1907_v20 = vpop.permute.xlu2 %1906  ;;  %2695 = vmatmul.msk.f32.vlgmr.msra.gmra.mxu2 %vm609_vm9, %v2693_v40 }
 0x310   : > { %v2202_v52 = vpop.permute.xlu0 %2201 }
 0x311   : > { %v1927_v4 = vpop.permute.xlu1 %1926  ;;  %v2235_v21 = vsel %vm371_vm1, %v3628_v12, %v2202_v52  ;;  %v2570_v52 = vld [vmem:[%s3969_s2] sm:$0xff] }
 0x312   : > { %v1960_v11 = vsel %vm371_vm1, %v3625_v7, %v1927_v4  ;;  %v2789_v4 = vmov 0  }
 0x313   : > { %v1961_v12 = vsel %vm373_vm2, %v1960_v11, %v3849_v17  ;;  %2753 = vset.pattern.permute.xlu0 %v2789_v4 }
 0x314   : > { %v2210_v53 = vpop.permute.xlu2 %2209  ;;  %2573 = vperm.xlu0 %2753, %v2570_v52  }
 0x318   : > { %v2178_v43 = vpop.permute.xlu0 %2177 }
 0x319   : > { %v1903_v48 = vpop.permute.xlu1 %1902  ;;  %v2229_v10 = vsel %vm373_vm2, %v2228_v16, %v2178_v43 }
 0x31a   : > { %v1954_v61 = vsel %vm373_vm2, %v1953_v0, %v1903_v48 }
 0x31b   : > { %v1955_v5 = vsel %vm375_vm3, %v1954_v61, %v1907_v20 }
 0x31c   : > { %v2186_v19 = vpop.permute.xlu2 %2185 }
 0x320   : > { %v1935_v22 = vpop.permute.xlu0 %1934 }
 0x321   : > { %v2206_v33 = vpop.permute.xlu1 %2205  ;;  %v1962_v42 = vsel %vm375_vm3, %v1961_v12, %v1935_v22 }
 0x322   : > { %v2236_v26 = vsel %vm373_vm2, %v2235_v21, %v2206_v33 }
 0x323   : > { %v2237_v7 = vsel %vm375_vm3, %v2236_v26, %v2210_v53 }
 0x324   : > { %v1943_v58 = vpop.permute.xlu2 %1942 }
 0x328   : > { %v1911_v59 = vpop.permute.xlu0 %1910 }
 0x329   : > { %v2182_v54 = vpop.permute.xlu1 %2181  ;;  %v1956_v9 = vsel %vm377_vm4, %v1955_v5, %v1911_v59  ;;  %v657_v5 = vpop.f32.mrf.mxu1 }
 0x32a   : > { %v2230_v2 = vsel %vm375_vm3, %v2229_v10, %v2182_v54  ;;  %v637_v10 = vpop.f32.mrf.mxu0 }
 0x32b   : > { %v2231_v13 = vsel %vm377_vm4, %v2230_v2, %v2186_v19 }
 0x32c   : > { %v1919_v49 = vpop.permute.xlu2 %1918 }
 0x330   : > { %v2214_v60 = vpop.permute.xlu0 %2213 }
 0x331   : > { %v1939_v62 = vpop.permute.xlu1 %1938  ;;  %v2238_v63 = vsel %vm377_vm4, %v2237_v7, %v2214_v60 }
 0x332   : > { %v1963_v25 = vsel %vm377_vm4, %v1962_v42, %v1939_v62 }
 0x333   : > { %v1964_v47 = vsel %vm379_vm5, %v1963_v25, %v1943_v58 }
 0x334   : > { %v2222_v55 = vpop.permute.xlu2 %2221 }
 0x338   : > { %v2190_v45 = vpop.permute.xlu0 %2189 }
 0x339   : > { %v1915_v34 = vpop.permute.xlu1 %1914  ;;  %v2232_v27 = vsel %vm379_vm5, %v2231_v13, %v2190_v45 }
 0x33a   : > { %v1957_v1 = vsel %vm379_vm5, %v1956_v9, %v1915_v34 }
 0x33b   : > { %v1958_v41 = vsel %vm381_vm6, %v1957_v1, %v1919_v49 }
 0x33c   : > { %v2198_v56 = vpop.permute.xlu2 %2197 }
 0x340   : > { %v1947_v8 = vpop.permute.xlu0 %1946 }
 0x341   : > { %v2218_v57 = vpop.permute.xlu1 %2217  ;;  %v1965_v18 = vsel %vm381_vm6, %v1964_v47, %v1947_v8 }
 0x342   : > { %v2239_v17 = vsel %vm379_vm5, %v2238_v63, %v2218_v57 }
 0x343   : > { %v2240_v31 = vsel %vm381_vm6, %v2239_v17, %v2222_v55 }
 0x344   : > { %v2477_v15 = vpop.permute.xlu2 %2476 }
 0x345   : > { %v2510_v58 = vsel %vm371_vm1, %v3783_v28, %v2477_v15 }
 0x348   : > { %v1923_v14 = vpop.permute.xlu0 %1922 }
 0x349   : > { %v1959_v37 = vsel %vm383_vm7, %v1958_v41, %v1923_v14  ;;  %v2194_v23 = vpop.permute.xlu1 %2193 }
 0x34a   : > { %v2233_v36 = vsel %vm381_vm6, %v2232_v27, %v2194_v23  ;;  %2699 = vmatpush.msk.msrb.mxu0 %vm613_vm8, %v1959_v37 }
 0x34b   : > { %v2234_v3 = vsel %vm383_vm7, %v2233_v36, %v2198_v56  ;;  %2700 = vmatmul.msk.f32.vlgmr.msrb.gmra.mxu0 %vm609_vm9, %v2698_v46 }
 0x34c   : > { %2704 = vmatpush.msk.msrb.mxu2 %vm613_vm8, %v2234_v3  ;;  %v2457_v32 = vpop.permute.xlu2 %2456 }
 0x34d   : > { %2705 = vmatmul.msk.f32.vlgmr.msrb.gmra.mxu2 %vm609_vm9, %v2703_v38 }
 0x350   : > { %v2226_v50 = vpop.permute.xlu0 %2225 }
 0x351   : > { %v2241_v51 = vsel %vm383_vm7, %v2240_v31, %v2226_v50  ;;  %v1951_v39 = vpop.permute.xlu1 %1950 }
 0x352   : > { %v1966_v29 = vsel %vm383_vm7, %v1965_v18, %v1951_v39  ;;  %2706 = vmatpush.msk.msrb.mxu3 %vm613_vm8, %v2241_v51  ;;  %v706_v40 = vpop.f32.mrf.mxu3 }
 0x353   : > { %2701 = vmatpush.msk.msrb.mxu1 %vm613_vm8, %v1966_v29  ;;  %2707 = vmatmul.msk.f32.vlgmr.msrb.gmra.mxu3 %vm609_vm9, %v2703_v38  ;;  %v686_v9 = vpop.f32.mrf.mxu2  ;;  %v707_v2 = vadd.f32 %v706_v40, %v657_v5 }
 0x354   : > { %2702 = vmatmul.msk.f32.vlgmr.msrb.gmra.mxu1 %vm609_vm9, %v2698_v46  ;;  %v2489_v53 = vpop.permute.xlu2 %2488  ;;  %v687_v26 = vadd.f32 %v686_v9, %v637_v10 }
 0x358   : > { %v2453_v35 = vpop.permute.xlu0 %2452 }
 0x359   : > { %v2449_v20 = vpop.permute.xlu1 %2448 }
 0x35a   : > { %v2503_v54 = vsel %vm371_vm1, %v3774_v24, %v2449_v20  ;;  %v2708_v24 = vld [vmem:[%s3968_s1 + $0x40] sm:$0xff] }
 0x35b   : > { %v2504_v30 = vsel %vm373_vm2, %v2503_v54, %v2453_v35 }
 0x35c   : > { %v2469_v22 = vpop.permute.xlu2 %2468  ;;  %v2505_v62 = vsel %vm375_vm3, %v2504_v30, %v2457_v32 }
 0x35e   : > { %v1222_v1 = vpop.f32.mrf.mxu3  ;;  %v1202_v13 = vpop.f32.mrf.mxu2 }
 0x360   : > { %v2485_v43 = vpop.permute.xlu0 %2484 }
 0x361   : > { %v2481_v48 = vpop.permute.xlu1 %2480 }
 0x362   : > { %v2511_v59 = vsel %vm373_vm2, %v2510_v58, %v2481_v48 }
 0x363   : > { %v2512_v6 = vsel %vm375_vm3, %v2511_v59, %v2485_v43 }
 0x364   : > { %v2513_v60 = vsel %vm377_vm4, %v2512_v6, %v2489_v53  ;;  %v2501_v34 = vpop.permute.xlu2 %2500 }
 0x368   : > { %v2465_v19 = vpop.permute.xlu0 %2464 }
 0x369   : > { %v2461_v33 = vpop.permute.xlu1 %2460 }
 0x36a   : > { %v2506_v28 = vsel %vm377_vm4, %v2505_v62, %v2461_v33 }
 0x36b   : > { %v2507_v8 = vsel %vm379_vm5, %v2506_v28, %v2465_v19 }
 0x36c   : > { %v2508_v57 = vsel %vm381_vm6, %v2507_v8, %v2469_v22 }
 0x370   : > { %v2497_v55 = vpop.permute.xlu0 %2496 }
 0x371   : > { %v2493_v49 = vpop.permute.xlu1 %2492 }
 0x372   : > { %v2514_v45 = vsel %vm379_vm5, %v2513_v60, %v2493_v49 }
 0x373   : > { %v2515_v0 = vsel %vm381_vm6, %v2514_v45, %v2497_v55 }
 0x374   : > { %v2516_v61 = vsel %vm383_vm7, %v2515_v0, %v2501_v34 }
 0x375   : > { %2711 = vmatpush.msk.msra.mxu1 %vm613_vm8, %v2516_v61  ;;  %v979_v44 = vpop.f32.mrf.mxu1  ;;  %v959_v21 = vpop.f32.mrf.mxu0 }
 0x376   : > { %2712 = vmatmul.msk.f32.vlgmr.msra.gmra.mxu1 %vm609_vm9, %v2708_v24  ;;  %v983_v11 = vadd.f32 %v979_v44, %v707_v2  ;;  %v982_v27 = vadd.f32 %v959_v21, %v687_v26 }
 0x378   : > { %v1226_v41 = vadd.f32 %v1222_v1, %v983_v11  ;;  %v1225_v12 = vadd.f32 %v1202_v13, %v982_v27 }
 0x379   : > { %v2473_v56 = vpop.permute.xlu1 %2472 }
 0x37a   : > { %v2509_v16 = vsel %vm383_vm7, %v2508_v57, %v2473_v56 }
 0x37b   : > { %2709 = vmatpush.msk.msra.mxu0 %vm613_vm8, %v2509_v16 }
 0x37c   : > { %2710 = vmatmul.msk.f32.vlgmr.msra.gmra.mxu0 %vm609_vm9, %v2708_v24 }
 0x386   : > { %v2574_v50 = vpop.permute.xlu0 %2573 }
 0x387   : > { %v1477_v36 = vpop.f32.mrf.mxu0 }
 0x388   : > { %v1497_v14 = vpop.f32.mrf.mxu1  ;;  %v1500_v38 = vadd.f32 %v1477_v36, %v1225_v12 }
 0x389   : > { %v1772_v37 = vpop.f32.mrf.mxu3  ;;  %v1501_v23 = vadd.f32 %v1497_v14, %v1226_v41 }
 0x38b   : > { %v1776_v7 = vadd.f32 %v1772_v37, %v1501_v23 }
 0x38f   : > { %v1752_v15 = vpop.f32.mrf.mxu2 }
 0x390   : > { %v1775_v63 = vadd.f32 %v1752_v15, %v1500_v38 }
 0x3c8   : > { %v1995_v25 = vpop.f32.mrf.mxu0 }
 0x3c9   : > { %v2018_v31 = vadd.f32 %v1995_v25, %v1775_v63 }
 0x3d0   : > { %v2270_v51 = vpop.f32.mrf.mxu2 }
 0x3d1   : > { %v2015_v3 = vpop.f32.mrf.mxu1  ;;  %v2293_v29 = vadd.f32 %v2270_v51, %v2018_v31 }
 0x3d2   : > { %v2019_v46 = vadd.f32 %v2015_v3, %v1776_v7 }
 0x3d6   : > { %v2290_v42 = vpop.f32.mrf.mxu3 }
 0x3d7   : > { %v2294_v17 = vadd.f32 %v2290_v42, %v2019_v46 }
 0x3f3   : > { %v2565_v47 = vpop.f32.mrf.mxu1 }
 0x3f4   : > { %v2569_v18 = vadd.f32 %v2565_v47, %v2294_v17 }
 0x3f6   : > { %v2577_v39 = vadd.f32 %v2574_v50, %v2569_v18 }
 0x3f8   : > { %2579 = vst [vmem:[%s192_s29 + $0x8] sm:$0xff] %v2577_v39 }
 0x3f9   : > { %v2545_v32 = vpop.f32.mrf.mxu0 }
 0x3fa   : > { %v2568_v35 = vadd.f32 %v2545_v32, %v2293_v29 }
 0x3fc   : > { %v2576_v20 = vadd.f32 %v2574_v50, %v2568_v35 }
 0x3fe   : > { %2578 = vst [vmem:[%s192_s29] sm:$0xff] %v2576_v20 }
 0x3ff PF: > { %s13_s14 = sadd.s32 1, %s2776_s14   ;;  %s3971_s12 = smov %s2772_s13 }
 0x400   : > { %p10_p5 = scmp.ge.s32.totalorder %s13_s14, 4   ;;  %s3972_s13 = smov %s3974_s15 }
 0x402   :  { %12 = sbr.rel (!%p10_p5) target bundleno = 2 (0x2), region = 70 }

</bundles_post_ra>
